<compile_context>
chip_gen: v7x
topology: tpu7x:2x2x1
jax: 0.10.0
libtpu: 0.0.40
codegen_flags: <defaults>
</compile_context>

<pallas_src>
import functools

import jax
import jax.numpy as jnp
from jax.experimental import pallas as pl
from jax.experimental.pallas import tpu as pltpu

# ----------------------------- config --------------------------------------
B = 2          # batch
N = 8          # number of "center" tokens
M = 4          # neighbors per center token
DIM = 32       # model dim
HEADS = 1      # Transformer default
DIM_HEAD = 64  # Transformer default
DEPTH = 1      # Transformer default
INNER = HEADS * DIM_HEAD
LN_EPS = 1e-5
SCALE = DIM_HEAD ** (-0.5)
LANE = 128
DIM_PAD = ((DIM + LANE - 1) // LANE) * LANE   # feature dim padded to lane width
# project_out = not (heads == 1 and dim_head == dim) -> True here (64 != 32),
# so to_out = Linear(INNER, DIM) (+ Dropout(0.0) == identity).


# ----------------------------- kernel --------------------------------------
def _cross_attn_layer_kernel(x_ref, y_ref, gamma_ref, beta_ref,
                             wq_t_ref, wkv_t_ref, wout_t_ref, bout_ref,
                             o_ref, *, heads, dim_head, m_ctx, true_dim, eps):
    """One PreNorm_CA(Cross_attention) layer + residual, fully fused.

    x_ref:      (T, DIM_PAD)        center tokens (lane-padded, pads are 0)
    y_ref:      (T*M, DIM_PAD)      neighbor tokens, token-major flattened
    gamma/beta: (1, DIM_PAD)        LayerNorm params (zero in padded lanes)
    wq_t:       (DIM_PAD, INNER)    to_q weight^T, softmax scale pre-folded
    wkv_t:      (DIM_PAD, 2*INNER)  to_kv weight^T
    wout_t:     (INNER, DIM_PAD)    to_out weight^T (zero in padded columns)
    bout:       (1, DIM_PAD)        to_out bias (zero in padded lanes)
    o_ref:      (T, DIM_PAD)        output = attention(x, y) + x
    """
    inner = heads * dim_head
    gamma = gamma_ref[...]
    beta = beta_ref[...]

    def layer_norm(t):
        # t: (rows, DIM_PAD); real features in lanes [0, true_dim), pads are 0.
        mu = jnp.sum(t, axis=-1, keepdims=True) * (1.0 / true_dim)
        lane = jax.lax.broadcasted_iota(jnp.int32, t.shape, 1)
        centered = jnp.where(lane < true_dim, t - mu, 0.0)
        var = jnp.sum(centered * centered, axis=-1, keepdims=True) * (1.0 / true_dim)
        return centered * jax.lax.rsqrt(var + eps) * gamma + beta

    x = x_ref[...].astype(jnp.float32)                       # (T, DP)
    rows = x.shape[0]

    # q projection (softmax scale already folded into wq_t).
    q = jnp.dot(layer_norm(x), wq_t_ref[...],
                preferred_element_type=jnp.float32)          # (T, INNER)

    # Single fused LayerNorm + kv projection over all T*M neighbor tokens.
    yn = layer_norm(y_ref[...].astype(jnp.float32))          # (T*M, DP)
    kv = jnp.dot(yn, wkv_t_ref[...],
                 preferred_element_type=jnp.float32)         # (T*M, 2*INNER)
    kv = kv.reshape(rows, m_ctx, 2 * inner)                  # (T, M, 2*INNER)
    k = kv[:, :, :inner]
    v = kv[:, :, inner:]

    wout_t = wout_t_ref[...]                                 # (INNER, DP)
    proj = None
    for h in range(heads):        # HEADS == 1 -> single pass, no accumulators
        lo = h * dim_head
        qh = q[:, lo:lo + dim_head]                          # (T, dh)
        kh = k[:, :, lo:lo + dim_head]                       # (T, M, dh)
        vh = v[:, :, lo:lo + dim_head]                       # (T, M, dh)

        # Stacked softmax over the M (neighbor) axis — single max/exp/sum.
        dots = jnp.sum(qh[:, None, :] * kh, axis=-1, keepdims=True)   # (T, M, 1)
        dmax = jnp.max(dots, axis=1, keepdims=True)                   # (T, 1, 1)
        e = jnp.exp(dots - dmax)                                      # (T, M, 1)
        inv = pl.reciprocal(jnp.sum(e, axis=1, keepdims=True), approx=True)
        attn = e * inv                                                # (T, M, 1)
        outh = jnp.sum(attn * vh, axis=1)                             # (T, dh)

        # Fold the head-concat into the output projection (row slice of W_out^T).
        contrib = jnp.dot(outh, wout_t[lo:lo + dim_head, :],
                          preferred_element_type=jnp.float32)         # (T, DP)
        proj = contrib if proj is None else proj + contrib

    # to_out bias + residual (pre-norm x). Padded lanes remain exactly 0.
    o_ref[...] = (proj + bout_ref[...] + x).astype(o_ref.dtype)


# ----------------------------- wrapper --------------------------------------
def cross_attn_layer(x_pad, y_pad, p):
    """One layer. x_pad: (BN, DIM_PAD), y_pad: (BN*M, DIM_PAD) token-major."""
    bn, dp = x_pad.shape
    m_ctx = y_pad.shape[0] // bn
    tile = min(bn, 128)
    assert bn % tile == 0
    grid = (bn // tile,)

    kernel = functools.partial(
        _cross_attn_layer_kernel,
        heads=HEADS, dim_head=DIM_HEAD, m_ctx=m_ctx, true_dim=DIM, eps=LN_EPS)

    return pl.pallas_call(
        kernel,
        out_shape=jax.ShapeDtypeStruct((bn, dp), x_pad.dtype),
        grid_spec=pltpu.PrefetchScalarGridSpec(
            num_scalar_prefetch=0,
            grid=grid,
            in_specs=[
                pl.BlockSpec((tile, dp), lambda i: (i, 0)),           # x
                pl.BlockSpec((tile * m_ctx, dp), lambda i: (i, 0)),   # y
                pl.BlockSpec((1, dp), lambda i: (0, 0)),              # gamma
                pl.BlockSpec((1, dp), lambda i: (0, 0)),              # beta
                pl.BlockSpec((dp, INNER), lambda i: (0, 0)),          # wq_t
                pl.BlockSpec((dp, 2 * INNER), lambda i: (0, 0)),      # wkv_t
                pl.BlockSpec((INNER, dp), lambda i: (0, 0)),          # wout_t
                pl.BlockSpec((1, dp), lambda i: (0, 0)),              # bout
            ],
            out_specs=pl.BlockSpec((tile, dp), lambda i: (i, 0)),
        ),
        compiler_params=pltpu.CompilerParams(
            dimension_semantics=("parallel",)),   # token tiles -> v7x 2nd TC
    )(x_pad, y_pad, p['gamma'], p['beta'],
      p['wq_t'], p['wkv_t'], p['wout_t'], p['bout'])


def _pad_lanes(a, dp=DIM_PAD):
    pad = dp - a.shape[-1]
    if pad == 0:
        return a
    return jnp.pad(a, [(0, 0)] * (a.ndim - 1) + [(0, pad)])


def _prep_params(p):
    """Pad params to lane-dense shapes; fold softmax scale into wq_t."""
    rpad = DIM_PAD - DIM
    return {
        'gamma': _pad_lanes(p['gamma']),
        'beta': _pad_lanes(p['beta']),
        'wq_t': jnp.pad(p['wq_t'] * SCALE, ((0, rpad), (0, 0))),   # (DP, INNER)
        'wkv_t': jnp.pad(p['wkv_t'], ((0, rpad), (0, 0))),         # (DP, 2*INNER)
        'wout_t': jnp.pad(p['wout_t'], ((0, 0), (0, rpad))),       # (INNER, DP)
        'bout': _pad_lanes(p['bout']),
    }


def transformer_forward(x, y, prepped_layer_params):
    """Matches Transformer.forward(x, y=y) with pos_embedding=None.

    x: (B, N, DIM), y: (B, N, M, DIM).  Returns {'ct_feat': (B, N, DIM)}.
    """
    b, n, dim = x.shape
    m_ctx = y.shape[2]
    x2 = _pad_lanes(x.reshape(b * n, dim))             # (BN, DP), pads = 0
    y2 = _pad_lanes(y.reshape(b * n * m_ctx, dim))     # (BN*M, DP), pads = 0
    # DEPTH == 1 here; for deeper stacks the layers could be fused into a single
    # pallas_call with weights resident in VMEM (avoids per-layer HBM round trip).
    for p in prepped_layer_params:
        x2 = cross_attn_layer(x2, y2, p)               # y reused every layer
    return {'ct_feat': x2[:, :dim].reshape(b, n, dim)}


# ------------------------- pure-JAX reference -------------------------------
def _reference(x, y, layer_params):
    b, n, dim = x.shape
    m_ctx = y.shape[2]
    for p in layer_params:
        g = p['gamma'].reshape(-1)
        be = p['beta'].reshape(-1)

        def ln(t):
            mu = t.mean(-1, keepdims=True)
            var = ((t - mu) ** 2).mean(-1, keepdims=True)
            return (t - mu) / jnp.sqrt(var + LN_EPS) * g + be

        xn, yn = ln(x), ln(y)
        q = xn @ p['wq_t']                                   # (B,N,INNER)
        kv = yn @ p['wkv_t']                                 # (B,N,M,2*INNER)
        k, v = kv[..., :INNER], kv[..., INNER:]
        q_ = q.reshape(b, n, HEADS, DIM_HEAD)
        k_ = k.reshape(b, n, m_ctx, HEADS, DIM_HEAD)
        v_ = v.reshape(b, n, m_ctx, HEADS, DIM_HEAD)
        dots = jnp.einsum('bnhd,bnmhd->bnhm', q_, k_) * SCALE
        attn = jax.nn.softmax(dots, axis=-1)
        out = jnp.einsum('bnhm,bnmhd->bnhd', attn, v_).reshape(b, n, INNER)
        x = out @ p['wout_t'] + p['bout'].reshape(-1) + x
    return x


# ----------------------------- main -----------------------------------------
def _init_layer_params(key):
    kq, kkv, kw, kb = jax.random.split(key, 4)
    return {
        # LayerNorm defaults: weight=1, bias=0
        'gamma': jnp.ones((1, DIM), jnp.float32),
        'beta': jnp.zeros((1, DIM), jnp.float32),
        # Linear weights stored pre-transposed: y = x @ W^T  ->  x @ w_t
        'wq_t': jax.random.normal(kq, (DIM, INNER), jnp.float32) * 0.05,
        'wkv_t': jax.random.normal(kkv, (DIM, 2 * INNER), jnp.float32) * 0.05,
        'wout_t': jax.random.normal(kw, (INNER, DIM), jnp.float32) * 0.05,
        'bout': jax.random.normal(kb, (1, DIM), jnp.float32) * 0.05,
    }


if __name__ == "__main__":
    root = jax.random.PRNGKey(0)
    kx, ky, kp = jax.random.split(root, 3)

    x = jax.random.normal(kx, (B, N, DIM), jnp.float32)
    y = jax.random.normal(ky, (B, N, M, DIM), jnp.float32)

    layer_keys = jax.random.split(kp, DEPTH)
    layer_params = [_init_layer_params(k) for k in layer_keys]
    prepped = [_prep_params(p) for p in layer_params]

    out = transformer_forward(x, y, prepped)
    ct = jax.block_until_ready(out['ct_feat'])

    ref = jax.block_until_ready(_reference(x, y, layer_params))
    assert ct.shape == (B, N, DIM)
    # tolerance slightly relaxed vs 1e-4 because of pl.reciprocal(approx=True)
    assert jnp.allclose(ct, ref, atol=2e-3, rtol=2e-3), float(jnp.max(jnp.abs(ct - ref)))

    print("KERNEL_OK")
</pallas_src>

<mosaic_0001>
module attributes {stable_mosaic.version = 11 : i64} {
  func.func @_cross_attn_layer_kernel(%arg0: i32, %arg1: memref<16x128xf32, #tpu.memory_space<vmem>>, %arg2: memref<64x128xf32, #tpu.memory_space<vmem>>, %arg3: memref<1x128xf32, #tpu.memory_space<vmem>>, %arg4: memref<1x128xf32, #tpu.memory_space<vmem>>, %arg5: memref<128x64xf32, #tpu.memory_space<vmem>>, %arg6: memref<128x128xf32, #tpu.memory_space<vmem>>, %arg7: memref<64x128xf32, #tpu.memory_space<vmem>>, %arg8: memref<1x128xf32, #tpu.memory_space<vmem>>, %arg9: memref<16x128xf32, #tpu.memory_space<vmem>>) attributes {dimension_semantics = [#tpu.dimension_semantics<parallel>], iteration_bounds = array<i64: 1>, scalar_prefetch = 0 : i64, scratch_operands = 0 : i64, tpu.core_type = #tpu.core_type<tc>, window_params = [{transform_indices = @transform_0, window_bounds = array<i64: 16, 128>}, {transform_indices = @transform_1, window_bounds = array<i64: 64, 128>}, {pipeline_mode = #tpu.pipeline_mode<synchronous>, transform_indices = @transform_2, window_bounds = array<i64: 1, 128>}, {pipeline_mode = #tpu.pipeline_mode<synchronous>, transform_indices = @transform_3, window_bounds = array<i64: 1, 128>}, {pipeline_mode = #tpu.pipeline_mode<synchronous>, transform_indices = @transform_4, window_bounds = array<i64: 128, 64>}, {pipeline_mode = #tpu.pipeline_mode<synchronous>, transform_indices = @transform_5, window_bounds = array<i64: 128, 128>}, {pipeline_mode = #tpu.pipeline_mode<synchronous>, transform_indices = @transform_6, window_bounds = array<i64: 64, 128>}, {pipeline_mode = #tpu.pipeline_mode<synchronous>, transform_indices = @transform_7, window_bounds = array<i64: 1, 128>}, {transform_indices = @transform_8, window_bounds = array<i64: 16, 128>}]} {
    %c0 = arith.constant 0 : index
    %c0_0 = arith.constant 0 : index
    %0 = vector.load %arg3[%c0, %c0_0] : memref<1x128xf32, #tpu.memory_space<vmem>>, vector<1x128xf32>
    %c0_1 = arith.constant 0 : index
    %c0_2 = arith.constant 0 : index
    %1 = vector.load %arg4[%c0_1, %c0_2] : memref<1x128xf32, #tpu.memory_space<vmem>>, vector<1x128xf32>
    %c0_3 = arith.constant 0 : index
    %c0_4 = arith.constant 0 : index
    %2 = vector.load %arg1[%c0_3, %c0_4] : memref<16x128xf32, #tpu.memory_space<vmem>>, vector<16x128xf32>
    %cst = arith.constant dense<0.000000e+00> : vector<16xf32>
    %3 = vector.multi_reduction <add>, %2, %cst [1] : vector<16x128xf32> to vector<16xf32>
    %4 = vector.shape_cast %3 : vector<16xf32> to vector<16x1xf32>
    %cst_5 = arith.constant 3.125000e-02 : f32
    %5 = vector.broadcast %cst_5 : f32 to vector<16x1xf32>
    %6 = arith.mulf %4, %5 : vector<16x1xf32>
    %7 = tpu.iota {dimensions = array<i32: 1>} : vector<16x128xi32>
    %c32_i32 = arith.constant 32 : i32
    %8 = vector.broadcast %c32_i32 : i32 to vector<16x128xi32>
    %9 = arith.cmpi slt, %7, %8 : vector<16x128xi32>
    %10 = vector.broadcast %6 : vector<16x1xf32> to vector<16x128xf32>
    %11 = arith.subf %2, %10 : vector<16x128xf32>
    %cst_6 = arith.constant 0.000000e+00 : f32
    %12 = vector.broadcast %cst_6 : f32 to vector<16x128xf32>
    %13 = arith.select %9, %11, %12 : vector<16x128xi1>, vector<16x128xf32>
    %14 = arith.mulf %13, %13 : vector<16x128xf32>
    %cst_7 = arith.constant dense<0.000000e+00> : vector<16xf32>
    %15 = vector.multi_reduction <add>, %14, %cst_7 [1] : vector<16x128xf32> to vector<16xf32>
    %16 = vector.shape_cast %15 : vector<16xf32> to vector<16x1xf32>
    %cst_8 = arith.constant 3.125000e-02 : f32
    %17 = vector.broadcast %cst_8 : f32 to vector<16x1xf32>
    %18 = arith.mulf %16, %17 : vector<16x1xf32>
    %cst_9 = arith.constant 9.99999974E-6 : f32
    %19 = vector.broadcast %cst_9 : f32 to vector<16x1xf32>
    %20 = arith.addf %18, %19 : vector<16x1xf32>
    %21 = math.rsqrt %20 : vector<16x1xf32>
    %22 = vector.broadcast %21 : vector<16x1xf32> to vector<16x128xf32>
    %23 = arith.mulf %13, %22 : vector<16x128xf32>
    %24 = vector.broadcast %0 : vector<1x128xf32> to vector<16x128xf32>
    %25 = arith.mulf %23, %24 : vector<16x128xf32>
    %26 = vector.broadcast %1 : vector<1x128xf32> to vector<16x128xf32>
    %27 = arith.addf %25, %26 : vector<16x128xf32>
    %c0_10 = arith.constant 0 : index
    %c0_11 = arith.constant 0 : index
    %28 = vector.load %arg5[%c0_10, %c0_11] : memref<128x64xf32, #tpu.memory_space<vmem>>, vector<128x64xf32>
    %cst_12 = arith.constant dense<0.000000e+00> : vector<16x64xf32>
    %29 = tpu.matmul %27, %28, %cst_12 {dimension_numbers = #tpu.dot_dimension_numbers<[1], [0], [0], [1], [0, 0, 1, 1], [], []>} : vector<16x128xf32>, vector<128x64xf32>, vector<16x64xf32> -> vector<16x64xf32>
    %c0_13 = arith.constant 0 : index
    %c0_14 = arith.constant 0 : index
    %30 = vector.load %arg2[%c0_13, %c0_14] : memref<64x128xf32, #tpu.memory_space<vmem>>, vector<64x128xf32>
    %cst_15 = arith.constant dense<0.000000e+00> : vector<64xf32>
    %31 = vector.multi_reduction <add>, %30, %cst_15 [1] : vector<64x128xf32> to vector<64xf32>
    %32 = vector.shape_cast %31 : vector<64xf32> to vector<64x1xf32>
    %cst_16 = arith.constant 3.125000e-02 : f32
    %33 = vector.broadcast %cst_16 : f32 to vector<64x1xf32>
    %34 = arith.mulf %32, %33 : vector<64x1xf32>
    %35 = tpu.iota {dimensions = array<i32: 1>} : vector<64x128xi32>
    %c32_i32_17 = arith.constant 32 : i32
    %36 = vector.broadcast %c32_i32_17 : i32 to vector<64x128xi32>
    %37 = arith.cmpi slt, %35, %36 : vector<64x128xi32>
    %38 = vector.broadcast %34 : vector<64x1xf32> to vector<64x128xf32>
    %39 = arith.subf %30, %38 : vector<64x128xf32>
    %cst_18 = arith.constant 0.000000e+00 : f32
    %40 = vector.broadcast %cst_18 : f32 to vector<64x128xf32>
    %41 = arith.select %37, %39, %40 : vector<64x128xi1>, vector<64x128xf32>
    %42 = arith.mulf %41, %41 : vector<64x128xf32>
    %cst_19 = arith.constant dense<0.000000e+00> : vector<64xf32>
    %43 = vector.multi_reduction <add>, %42, %cst_19 [1] : vector<64x128xf32> to vector<64xf32>
    %44 = vector.shape_cast %43 : vector<64xf32> to vector<64x1xf32>
    %cst_20 = arith.constant 3.125000e-02 : f32
    %45 = vector.broadcast %cst_20 : f32 to vector<64x1xf32>
    %46 = arith.mulf %44, %45 : vector<64x1xf32>
    %cst_21 = arith.constant 9.99999974E-6 : f32
    %47 = vector.broadcast %cst_21 : f32 to vector<64x1xf32>
    %48 = arith.addf %46, %47 : vector<64x1xf32>
    %49 = math.rsqrt %48 : vector<64x1xf32>
    %50 = vector.broadcast %49 : vector<64x1xf32> to vector<64x128xf32>
    %51 = arith.mulf %41, %50 : vector<64x128xf32>
    %52 = vector.broadcast %0 : vector<1x128xf32> to vector<64x128xf32>
    %53 = arith.mulf %51, %52 : vector<64x128xf32>
    %54 = vector.broadcast %1 : vector<1x128xf32> to vector<64x128xf32>
    %55 = arith.addf %53, %54 : vector<64x128xf32>
    %c0_22 = arith.constant 0 : index
    %c0_23 = arith.constant 0 : index
    %56 = vector.load %arg6[%c0_22, %c0_23] : memref<128x128xf32, #tpu.memory_space<vmem>>, vector<128x128xf32>
    %cst_24 = arith.constant dense<0.000000e+00> : vector<64x128xf32>
    %57 = tpu.matmul %55, %56, %cst_24 {dimension_numbers = #tpu.dot_dimension_numbers<[1], [0], [0], [1], [0, 0, 1, 1], [], []>} : vector<64x128xf32>, vector<128x128xf32>, vector<64x128xf32> -> vector<64x128xf32>
    %58 = vector.shape_cast %57 : vector<64x128xf32> to vector<16x4x128xf32>
    %59 = vector.extract_strided_slice %58 {offsets = [0, 0, 0], sizes = [16, 4, 64], strides = [1, 1, 1]} : vector<16x4x128xf32> to vector<16x4x64xf32>
    %60 = vector.extract_strided_slice %58 {offsets = [0, 0, 64], sizes = [16, 4, 64], strides = [1, 1, 1]} : vector<16x4x128xf32> to vector<16x4x64xf32>
    %c0_25 = arith.constant 0 : index
    %c0_26 = arith.constant 0 : index
    %61 = vector.load %arg7[%c0_25, %c0_26] : memref<64x128xf32, #tpu.memory_space<vmem>>, vector<64x128xf32>
    %62 = vector.shape_cast %29 : vector<16x64xf32> to vector<16x1x64xf32>
    %63 = vector.broadcast %62 : vector<16x1x64xf32> to vector<16x4x64xf32>
    %64 = arith.mulf %63, %59 : vector<16x4x64xf32>
    %cst_27 = arith.constant dense<0.000000e+00> : vector<16x4xf32>
    %65 = vector.multi_reduction <add>, %64, %cst_27 [2] : vector<16x4x64xf32> to vector<16x4xf32>
    %66 = vector.shape_cast %65 : vector<16x4xf32> to vector<16x4x1xf32>
    %cst_28 = arith.constant dense<0xFF800000> : vector<16x1xf32>
    %67 = vector.multi_reduction <maximumf>, %66, %cst_28 [1] : vector<16x4x1xf32> to vector<16x1xf32>
    %68 = vector.shape_cast %67 : vector<16x1xf32> to vector<16x1x1xf32>
    %69 = vector.broadcast %68 : vector<16x1x1xf32> to vector<16x4x1xf32>
    %70 = arith.subf %66, %69 : vector<16x4x1xf32>
    %71 = math.exp %70 : vector<16x4x1xf32>
    %cst_29 = arith.constant dense<0.000000e+00> : vector<16x1xf32>
    %72 = vector.multi_reduction <add>, %71, %cst_29 [1] : vector<16x4x1xf32> to vector<16x1xf32>
    %73 = vector.shape_cast %72 : vector<16x1xf32> to vector<16x1x1xf32>
    %74 = tpu.reciprocal %73 {approx = true} : vector<16x1x1xf32> -> vector<16x1x1xf32>
    %75 = vector.broadcast %74 : vector<16x1x1xf32> to vector<16x4x1xf32>
    %76 = arith.mulf %71, %75 : vector<16x4x1xf32>
    %77 = vector.broadcast %76 : vector<16x4x1xf32> to vector<16x4x64xf32>
    %78 = arith.mulf %77, %60 : vector<16x4x64xf32>
    %cst_30 = arith.constant dense<0.000000e+00> : vector<16x64xf32>
    %79 = vector.multi_reduction <add>, %78, %cst_30 [1] : vector<16x4x64xf32> to vector<16x64xf32>
    %cst_31 = arith.constant dense<0.000000e+00> : vector<16x128xf32>
    %80 = tpu.matmul %79, %61, %cst_31 {dimension_numbers = #tpu.dot_dimension_numbers<[1], [0], [0], [1], [0, 0, 1, 1], [], []>} : vector<16x64xf32>, vector<64x128xf32>, vector<16x128xf32> -> vector<16x128xf32>
    %c0_32 = arith.constant 0 : index
    %c0_33 = arith.constant 0 : index
    %81 = vector.load %arg8[%c0_32, %c0_33] : memref<1x128xf32, #tpu.memory_space<vmem>>, vector<1x128xf32>
    %82 = vector.broadcast %81 : vector<1x128xf32> to vector<16x128xf32>
    %83 = arith.addf %80, %82 : vector<16x128xf32>
    %84 = arith.addf %83, %2 : vector<16x128xf32>
    %c0_34 = arith.constant 0 : index
    %c0_35 = arith.constant 0 : index
    %85 = vector.load %arg9[%c0_34, %c0_35] : memref<16x128xf32, #tpu.memory_space<vmem>>, vector<16x128xf32>
    tpu.vector_store %arg9[%c0_34, %c0_35], %84 {strides = array<i32>} : memref<16x128xf32, #tpu.memory_space<vmem>>, vector<16x128xf32>,
    return
  }
  func.func @transform_0(%arg0: i32) -> (i32, i32) {
    %c0_i32 = arith.constant 0 : i32
    %c0_i32_0 = arith.constant 0 : i32
    return %arg0, %c0_i32 : i32, i32
  }
  func.func @transform_1(%arg0: i32) -> (i32, i32) {
    %c0_i32 = arith.constant 0 : i32
    %c0_i32_0 = arith.constant 0 : i32
    return %arg0, %c0_i32 : i32, i32
  }
  func.func @transform_2(%arg0: i32) -> (i32, i32) {
    %c0_i32 = arith.constant 0 : i32
    %c0_i32_0 = arith.constant 0 : i32
    %c0_i32_1 = arith.constant 0 : i32
    return %c0_i32, %c0_i32_0 : i32, i32
  }
  func.func @transform_3(%arg0: i32) -> (i32, i32) {
    %c0_i32 = arith.constant 0 : i32
    %c0_i32_0 = arith.constant 0 : i32
    %c0_i32_1 = arith.constant 0 : i32
    return %c0_i32, %c0_i32_0 : i32, i32
  }
  func.func @transform_4(%arg0: i32) -> (i32, i32) {
    %c0_i32 = arith.constant 0 : i32
    %c0_i32_0 = arith.constant 0 : i32
    %c0_i32_1 = arith.constant 0 : i32
    return %c0_i32, %c0_i32_0 : i32, i32
  }
  func.func @transform_5(%arg0: i32) -> (i32, i32) {
    %c0_i32 = arith.constant 0 : i32
    %c0_i32_0 = arith.constant 0 : i32
    %c0_i32_1 = arith.constant 0 : i32
    return %c0_i32, %c0_i32_0 : i32, i32
  }
  func.func @transform_6(%arg0: i32) -> (i32, i32) {
    %c0_i32 = arith.constant 0 : i32
    %c0_i32_0 = arith.constant 0 : i32
    %c0_i32_1 = arith.constant 0 : i32
    return %c0_i32, %c0_i32_0 : i32, i32
  }
  func.func @transform_7(%arg0: i32) -> (i32, i32) {
    %c0_i32 = arith.constant 0 : i32
    %c0_i32_0 = arith.constant 0 : i32
    %c0_i32_1 = arith.constant 0 : i32
    return %c0_i32, %c0_i32_0 : i32, i32
  }
  func.func @transform_8(%arg0: i32) -> (i32, i32) {
    %c0_i32 = arith.constant 0 : i32
    %c0_i32_0 = arith.constant 0 : i32
    return %arg0, %c0_i32 : i32, i32
  }
}

</mosaic_0001>

<bundles_post_ra>
// kernel: tpu_custom_call.1
= control target key start
LH: loop header
LB: loop body
LE: loop exit
PB: predicated region body
PF: predicated region fallthrough
CT: control target
= control target key end

     0   :  { %13 = vsyncpa [#allocation3], 0  ;;  %s2316_s0 = inlined_call_operand.vmem [shape: f32[16,128], index: 0, kind: input, shape index: {}]   ;;  %s2317_s1 = inlined_call_operand.vmem [shape: f32[64,128], index: 1, kind: input, shape index: {}]   ;;  %s2318_s2 = inlined_call_operand.vmem [shape: f32[1,128], index: 2, kind: input, shape index: {}]   ;;  %s2319_s3 = inlined_call_operand.vmem [shape: f32[1,128], index: 3, kind: input, shape index: {}]   ;;  %s2320_s4 = inlined_call_operand.vmem [shape: f32[128,64], index: 4, kind: input, shape index: {}]   ;;  %s2321_s5 = inlined_call_operand.vmem [shape: f32[128,128], index: 5, kind: input, shape index: {}]   ;;  %s2322_s6 = inlined_call_operand.hbm [shape: f32[64,128], index: 6, kind: input, shape index: {}]   ;;  %s2323_s7 = inlined_call_operand.vmem [shape: f32[1,128], index: 7, kind: input, shape index: {}]   ;;  %s2324_s8 = inlined_call_operand.hbm [shape: f32[16,128], index: 8, kind: output, shape index: {}]  }
   0x1   :  { %14 = vsyncpa [#allocation4], 0  ;;  %s1701_s27 = smov [#allocation2]   ;;  %s1653_s9 = scalar_lea.hbm %s2322_s6, 1024 }
   0x2   :  { %s32_s28 = sshll.u32 %s1701_s27, 4  ;;  %p1654_p0 = scmp.ne.s32.totalorder %s2322_s6, %s1653_s9  ;;  %s33_s28 = int_to_ptr.vmem [resolvable:$true] %s32_s28 }
   0x3   :  { %p1657_p1 = scmp.lt.u32.totalorder %s1653_s9, %s2322_s6 }
   0x5   :  { %p1659_p2 = pnand %p1657_p1, %p1654_p0 }
   0x7   :  { %1662 = shalt.err (!%p1659_p2)
}
   0x8   :  { %s1663_s14 = scalar_lea.vmem %s33_s28, 1024  ;;  %p1668_p4 = scmp.lt.s32.totalorder %s33_s28, %s33_s28 }
   0x9   :  { %p1664_p3 = scmp.ne.s32.totalorder %s33_s28, %s1663_s14  ;;  %p1669_p5 = scmp.lt.s32.totalorder %s1663_s14, %s1663_s14 }
   0xb   :  { %p1670_p6 = por %p1669_p5, %p1668_p4 }
   0xd   :  { %p1671_p7 = pnand %p1670_p6, %p1664_p3 }
   0xf   :  { %1674 = shalt.err (!%p1671_p7)
}
  0x10   :  { %s1702_s15 = smov 128   ;;  %s1703_s16 = smov 8  }
  0x11   :  { %38 = dma.hbm_to_vmem [thread:$0]  %s2322_s6, 1024, %s33_s28, [#allocation3], %s1702_s15, %s1702_s15, %s1703_s16  }
  0x12   :  { %1697 = dma.done.wait [#allocation3], 1024  }
  0x13   :  { %1698 = vsyncadd [#allocation3], 4294966272  ;;  %v182_v0 = vld [vmem:[%s2317_s1] sm:$0xff]  ;;  %v183_v1 = vld [vmem:[%s2317_s1 + $0x8] sm:$0xff]  ;;  %v54_v19 = vlaneseq  ;;  %vm651_vm1 = vcmask 519168   ;;  %vm700_vm2 = vcmask 1043456  }
  0x14   :  { %190 = vadd.xlane.f32.xlu0 %v182_v0  ;;  %192 = vadd.xlane.f32.xlu1 %v183_v1  ;;  %v46_v2 = vld [vmem:[%s2316_s0] sm:$0xff]  ;;  %v47_v3 = vld [vmem:[%s2316_s0 + $0x8] sm:$0xff]  ;;  %v1782_v4 = vld [vmem:[%s2317_s1 + $0x10] sm:$0xff]  ;;  %vm1204_vm3 = vcmask 1041409   ;;  %vm1206_vm4 = vcmask 1042434   ;;  %vm1208_vm5 = vcmask 1043459  }
  0x15   :  { %v1787_v5 = vld [vmem:[%s2317_s1 + $0x18] sm:$0xff]  ;;  %v1794_v6 = vld [vmem:[%s2317_s1 + $0x20] sm:$0xff]  ;;  %v1799_v7 = vld [vmem:[%s2317_s1 + $0x28] sm:$0xff]  ;;  %v55_v20 = vand.u32 127, %v54_v19  ;;  %vm1210_vm6 = vcmask 1044484   ;;  %vm1212_vm7 = vcmask 1045509  }
  0x16   :  { %v1806_v8 = vld [vmem:[%s2317_s1 + $0x30] sm:$0xff]  ;;  %v1811_v9 = vld [vmem:[%s2317_s1 + $0x38] sm:$0xff]  ;;  %v302_v10 = vld [vmem:[%s2321_s5] sm:$0xff]  ;;  %vm1214_vm8 = vcmask 1046534   ;;  %vm1216_vm9 = vcmask 1047559   ;;  %vm1225_vm10 = vcmask 523264  }
  0x17   :  { %v303_v11 = vld [vmem:[%s2321_s5 + $0x8] sm:$0xff]  ;;  %v91_v12 = vld [vmem:[%s2320_s4] sm:$0xff]  ;;  %v304_v15 = vld [vmem:[%s2321_s5 + $0x10] sm:$0xff]  ;;  %vm56_vm0 = vcmp.lt.s32.totalorder %v55_v20, 32  ;;  %s1706_s19 = smov [#allocation5]  }
  0x18   :  { %48 = vadd.xlane.f32.xlu0 %v46_v2  ;;  %50 = vadd.xlane.f32.xlu1 %v47_v3  ;;  %v1513_v13 = vpack.c.bf16 %v303_v11, %v302_v10  ;;  %v92_v14 = vld [vmem:[%s2320_s4 + $0x8] sm:$0xff]  ;;  %v305_v16 = vld [vmem:[%s2321_s5 + $0x18] sm:$0xff]  ;;  %v97_v20 = vld [vmem:[%s2320_s4 + $0x30] sm:$0xff]  ;;  %s1314_s20 = sshll.u32 %s1706_s19, 4  ;;  %s1315_s20 = int_to_ptr.vmem [resolvable:$true] %s1314_s20 }
  0x19   :  { %v1481_v17 = vpack.c.bf16 %v92_v14, %v91_v12  ;;  %v1517_v18 = vpack.c.bf16 %v305_v16, %v304_v15  ;;  %v96_v14 = vld [vmem:[%s2320_s4 + $0x28] sm:$0xff]  ;;  %v308_v15 = vld [vmem:[%s2321_s5 + $0x30] sm:$0xff]  ;;  %p1680_p9 = scmp.lt.s32.totalorder %s1315_s20, %s1315_s20 }
  0x1a   :  { %1514 = vmatprep.subr.bf16.mxu1 %v1513_v13 }
  0x1b   :  { %1516 = vmatpush3.bf16.msra.mxu1 %v1513_v13  ;;  %1482 = vmatprep.subr.bf16.mxu0 %v1481_v17  ;;  %v95_v13 = vld [vmem:[%s2320_s4 + $0x20] sm:$0xff] }
  0x1c   :  { %194 = vadd.xlane.f32.xlu0 %v1782_v4  ;;  %196 = vadd.xlane.f32.xlu1 %v1787_v5  ;;  %v1489_v16 = vpack.c.bf16 %v96_v14, %v95_v13 }
  0x1d   :  { %1518 = vmatprep.subr.bf16.mxu1 %v1517_v18  ;;  %1484 = vmatpush3.bf16.msra.mxu0 %v1481_v17  ;;  %v309_v17 = vld [vmem:[%s2321_s5 + $0x38] sm:$0xff] }
  0x1f   :  { %1520 = vmatpush3.bf16.msra.mxu1 %v1517_v18  ;;  %v1525_v18 = vpack.c.bf16 %v309_v17, %v308_v15  ;;  %v1326_v15 = vld [vmem:[%s2318_s2] ss:$0 sm:$0xff]  ;;  %s1705_s2 = smov 64  }
  0x20   :  { %198 = vadd.xlane.f32.xlu0 %v1794_v6  ;;  %200 = vadd.xlane.f32.xlu1 %v1799_v7 }
  0x24   :  { %202 = vadd.xlane.f32.xlu0 %v1806_v8  ;;  %204 = vadd.xlane.f32.xlu1 %v1811_v9 }
  0xa1   :  { %v191_v21 = vpop.xlane.xlu0 %190  ;;  %v193_v22 = vpop.xlane.xlu1 %192 }
  0xa2   :  { %v206_v23 = vmul.f32 0.03125, %v191_v21  ;;  %v207_v24 = vmul.f32 0.03125, %v193_v22  ;;  %v98_v21 = vld [vmem:[%s2320_s4 + $0x38] sm:$0xff]  ;;  %v310_v22 = vld [vmem:[%s2321_s5 + $0x40] sm:$0xff] }
  0xa4   :  { %v214_v25 = vsub.f32 %v182_v0, %v206_v23  ;;  %v215_v26 = vsub.f32 %v183_v1, %v207_v24  ;;  %v1493_v23 = vpack.c.bf16 %v98_v21, %v97_v20  ;;  %v311_v24 = vld [vmem:[%s2321_s5 + $0x48] sm:$0xff] }
  0xa5   :  { %v49_v27 = vpop.xlane.xlu0 %48  ;;  %v51_v28 = vpop.xlane.xlu1 %50 }
  0xa6   :  { %v52_v29 = vmul.f32 0.03125, %v49_v27  ;;  %v53_v30 = vmul.f32 0.03125, %v51_v28  ;;  %v1835_v31 = vsel %vm56_vm0, %v214_v25, 0.0  ;;  %v1838_v32 = vsel %vm56_vm0, %v215_v26, 0.0  ;;  %v99_v26 = vld [vmem:[%s2320_s4 + $0x40] sm:$0xff]  ;;  %v100_v27 = vld [vmem:[%s2320_s4 + $0x48] sm:$0xff] }
  0xa7   :  { %v230_v33 = vmul.f32 %v1835_v31, %v1835_v31  ;;  %v231_v38 = vmul.f32 %v1838_v32, %v1838_v32  ;;  %v1529_v25 = vpack.c.bf16 %v311_v24, %v310_v22  ;;  %v312_v28 = vld [vmem:[%s2321_s5 + $0x50] sm:$0xff]  ;;  %v1327_v22 = vld [vmem:[%s2319_s3] ss:$0 sm:$0xff] }
  0xa8   :  { %v57_v34 = vsub.f32 %v46_v2, %v52_v29  ;;  %v58_v35 = vsub.f32 %v47_v3, %v53_v30  ;;  %v93_v3 = vld [vmem:[%s2320_s4 + $0x10] sm:$0xff]  ;;  %v1497_v29 = vpack.c.bf16 %v100_v27, %v99_v26  ;;  %v313_v30 = vld [vmem:[%s2321_s5 + $0x58] sm:$0xff] }
  0xa9   :  { %238 = vadd.xlane.f32.xlu0 %v230_v33  ;;  %v195_v36 = vpop.xlane.xlu0 %194  ;;  %v197_v37 = vpop.xlane.xlu1 %196  ;;  %v1533_v33 = vpack.c.bf16 %v313_v30, %v312_v28 }
  0xaa   :  { %v208_v39 = vmul.f32 0.03125, %v195_v36  ;;  %v209_v40 = vmul.f32 0.03125, %v197_v37  ;;  %v1845_v41 = vsel %vm56_vm0, %v57_v34, 0.0  ;;  %v1848_v42 = vsel %vm56_vm0, %v58_v35, 0.0  ;;  %v101_v34 = vld [vmem:[%s2320_s4 + $0x50] sm:$0xff]  ;;  %v102_v35 = vld [vmem:[%s2320_s4 + $0x58] sm:$0xff] }
  0xab   :  { %v61_v43 = vmul.f32 %v1845_v41, %v1845_v41  ;;  %v62_v48 = vmul.f32 %v1848_v42, %v1848_v42  ;;  %v314_v36 = vld [vmem:[%s2321_s5 + $0x60] sm:$0xff]  ;;  %v1501_v37 = vpack.c.bf16 %v102_v35, %v101_v34 }
  0xac   :  { %v216_v44 = vsub.f32 %v1782_v4, %v208_v39  ;;  %v217_v45 = vsub.f32 %v1787_v5, %v209_v40  ;;  %v94_v4 = vld [vmem:[%s2320_s4 + $0x18] sm:$0xff]  ;;  %v306_v5 = vld [vmem:[%s2321_s5 + $0x20] sm:$0xff] }
  0xad   :  { %240 = vadd.xlane.f32.xlu0 %v231_v38  ;;  %63 = vadd.xlane.f32.xlu1 %v61_v43  ;;  %v199_v46 = vpop.xlane.xlu0 %198  ;;  %v201_v47 = vpop.xlane.xlu1 %200  ;;  %v315_v38 = vld [vmem:[%s2321_s5 + $0x68] sm:$0xff]  ;;  %v103_v40 = vld [vmem:[%s2320_s4 + $0x60] sm:$0xff] }
  0xae   :  { %v210_v49 = vmul.f32 0.03125, %v199_v46  ;;  %v211_v50 = vmul.f32 0.03125, %v201_v47  ;;  %v1857_v51 = vsel %vm56_vm0, %v216_v44, 0.0  ;;  %v1860_v52 = vsel %vm56_vm0, %v217_v45, 0.0  ;;  %v104_v43 = vld [vmem:[%s2320_s4 + $0x68] sm:$0xff]  ;;  %v316_v44 = vld [vmem:[%s2321_s5 + $0x70] sm:$0xff] }
  0xaf   :  { %v232_v53 = vmul.f32 %v1857_v51, %v1857_v51  ;;  %v233_v58 = vmul.f32 %v1860_v52, %v1860_v52  ;;  %v1537_v39 = vpack.c.bf16 %v315_v38, %v314_v36  ;;  %v1505_v45 = vpack.c.bf16 %v104_v43, %v103_v40  ;;  %v317_v46 = vld [vmem:[%s2321_s5 + $0x78] sm:$0xff] }
  0xb0   :  { %v218_v54 = vsub.f32 %v1794_v6, %v210_v49  ;;  %v219_v55 = vsub.f32 %v1799_v7, %v211_v50  ;;  %v1541_v47 = vpack.c.bf16 %v317_v46, %v316_v44  ;;  %v106_v49 = vld [vmem:[%s2320_s4 + $0x78] sm:$0xff] }
  0xb1   :  { %65 = vadd.xlane.f32.xlu1 %v62_v48  ;;  %242 = vadd.xlane.f32.xlu0 %v232_v53  ;;  %v203_v56 = vpop.xlane.xlu0 %202  ;;  %v205_v57 = vpop.xlane.xlu1 %204  ;;  %v105_v48 = vld [vmem:[%s2320_s4 + $0x70] sm:$0xff] }
  0xb2   :  { %v212_v59 = vmul.f32 0.03125, %v203_v56  ;;  %v213_v60 = vmul.f32 0.03125, %v205_v57  ;;  %v1869_v61 = vsel %vm56_vm0, %v218_v54, 0.0  ;;  %v1872_v62 = vsel %vm56_vm0, %v219_v55, 0.0 }
  0xb3   :  { %v234_v63 = vmul.f32 %v1869_v61, %v1869_v61  ;;  %v235_v2 = vmul.f32 %v1872_v62, %v1872_v62  ;;  %v1509_v50 = vpack.c.bf16 %v106_v49, %v105_v48 }
  0xb4   :  { %v220_v0 = vsub.f32 %v1806_v8, %v212_v59  ;;  %v221_v1 = vsub.f32 %v1811_v9, %v213_v60  ;;  %v1485_v8 = vpack.c.bf16 %v94_v4, %v93_v3  ;;  %v307_v9 = vld [vmem:[%s2321_s5 + $0x28] sm:$0xff] }
  0xb5   :  { %244 = vadd.xlane.f32.xlu1 %v233_v58  ;;  %246 = vadd.xlane.f32.xlu0 %v234_v63  ;;  %v1521_v11 = vpack.c.bf16 %v307_v9, %v306_v5 }
  0xb6   :  { %v1890_v6 = vsel %vm56_vm0, %v220_v0, 0.0  ;;  %v1893_v7 = vsel %vm56_vm0, %v221_v1, 0.0  ;;  %1486 = vmatprep.subr.bf16.mxu0 %v1485_v8 }
  0xb7   :  { %v236_v10 = vmul.f32 %v1890_v6, %v1890_v6  ;;  %v237_v12 = vmul.f32 %v1893_v7, %v1893_v7  ;;  %1522 = vmatprep.subr.bf16.mxu1 %v1521_v11  ;;  %1488 = vmatpush3.bf16.msra.mxu0 %v1485_v8 }
  0xb8   :  { %1524 = vmatpush3.bf16.msra.mxu1 %v1521_v11  ;;  %1490 = vmatprep.subr.bf16.mxu0 %v1489_v16 }
  0xb9   :  { %248 = vadd.xlane.f32.xlu1 %v235_v2  ;;  %250 = vadd.xlane.f32.xlu0 %v236_v10 }
  0xba   :  { %1526 = vmatprep.subr.bf16.mxu1 %v1525_v18 }
  0xbb   :  { %1492 = vmatpush3.bf16.msra.mxu0 %v1489_v16 }
  0xbc   :  { %1528 = vmatpush3.bf16.msra.mxu1 %v1525_v18  ;;  %1494 = vmatprep.subr.bf16.mxu0 %v1493_v23 }
  0xbd   :  { %252 = vadd.xlane.f32.xlu1 %v237_v12  ;;  %1530 = vmatprep.subr.bf16.mxu1 %v1529_v25 }
  0xbf   :  { %1496 = vmatpush3.bf16.msra.mxu0 %v1493_v23 }
  0xc0   :  { %1532 = vmatpush3.bf16.msra.mxu1 %v1529_v25  ;;  %1498 = vmatprep.subr.bf16.mxu0 %v1497_v29 }
  0xc1   :  { %1534 = vmatprep.subr.bf16.mxu1 %v1533_v33 }
  0xc3   :  { %1500 = vmatpush3.bf16.msra.mxu0 %v1497_v29 }
  0xc4   :  { %1536 = vmatpush3.bf16.msra.mxu1 %v1533_v33  ;;  %1502 = vmatprep.subr.bf16.mxu0 %v1501_v37 }
  0xc5   :  { %1538 = vmatprep.subr.bf16.mxu1 %v1537_v39 }
  0xc7   :  { %1504 = vmatpush3.bf16.msra.mxu0 %v1501_v37 }
  0xc8   :  { %1540 = vmatpush3.bf16.msra.mxu1 %v1537_v39  ;;  %1506 = vmatprep.subr.bf16.mxu0 %v1505_v45 }
  0xc9   :  { %1542 = vmatprep.subr.bf16.mxu1 %v1541_v47 }
  0xcb   :  { %1508 = vmatpush3.bf16.msra.mxu0 %v1505_v45 }
  0xcc   :  { %1544 = vmatpush3.bf16.msra.mxu1 %v1541_v47  ;;  %1510 = vmatprep.subr.bf16.mxu0 %v1509_v50 }
  0xcf   :  { %1512 = vmatpush3.bf16.msra.mxu0 %v1509_v50 }
 0x136   :  { %v239_v53 = vpop.xlane.xlu0 %238 }
 0x137   :  { %v254_v54 = vmul.f32 0.03125, %v239_v53 }
 0x139   :  { %v262_v55 = vadd.f32 1e-05, %v254_v54 }
 0x13a   :  { %v64_v56 = vpop.xlane.xlu1 %63  ;;  %v241_v57 = vpop.xlane.xlu0 %240 }
 0x13b   :  { %1567 = vrsqrt.f32 %v262_v55  ;;  %v67_v58 = vmul.f32 0.03125, %v64_v56  ;;  %v255_v59 = vmul.f32 0.03125, %v241_v57 }
 0x13d   :  { %v69_v60 = vadd.f32 1e-05, %v67_v58  ;;  %v263_v63 = vadd.f32 1e-05, %v255_v59 }
 0x13e   :  { %v66_v0 = vpop.xlane.xlu1 %65  ;;  %v243_v1 = vpop.xlane.xlu0 %242 }
 0x13f   :  { %1569 = vrsqrt.f32 %v69_v60  ;;  %v68_v2 = vmul.f32 0.03125, %v66_v0  ;;  %v256_v3 = vmul.f32 0.03125, %v243_v1 }
 0x140   :  { %1571 = vrsqrt.f32 %v263_v63 }
 0x141   :  { %v70_v4 = vadd.f32 1e-05, %v68_v2  ;;  %v264_v5 = vadd.f32 1e-05, %v256_v3  ;;  %v1704_v3 = vmov 1966171168  }
 0x142   :  { %v245_v8 = vpop.xlane.xlu1 %244  ;;  %v247_v9 = vpop.xlane.xlu0 %246 }
 0x143   :  { %1573 = vrsqrt.f32 %v70_v4  ;;  %v257_v10 = vmul.f32 0.03125, %v245_v8  ;;  %v258_v11 = vmul.f32 0.03125, %v247_v9  ;;  %v459_v4 = vunpack.c.l.s4 %v1704_v3 }
 0x144   :  { %1575 = vrsqrt.f32 %v264_v5  ;;  %v462_v5 = vshrl.u32 %v54_v19, 7 }
 0x145   :  { %v1568_v12 = vpop.eup %1567  ;;  %v265_v13 = vadd.f32 1e-05, %v257_v10  ;;  %v266_v14 = vadd.f32 1e-05, %v258_v11 }
 0x146   :  { %v249_v16 = vpop.xlane.xlu1 %248  ;;  %v251_v17 = vpop.xlane.xlu0 %250  ;;  %v278_v18 = vmul.f32 %v1568_v12, %v1835_v31 }
 0x147   :  { %1577 = vrsqrt.f32 %v265_v13  ;;  %v259_v20 = vmul.f32 0.03125, %v249_v16  ;;  %v260_v21 = vmul.f32 0.03125, %v251_v17 }
 0x148   :  { %1579 = vrsqrt.f32 %v266_v14  ;;  %v286_v23 = vmul.f32 %v1326_v15, %v278_v18 }
 0x149   :  { %v1570_v24 = vpop.eup %1569  ;;  %v267_v25 = vadd.f32 1e-05, %v259_v20  ;;  %v268_v26 = vadd.f32 1e-05, %v260_v21 }
 0x14a   :  { %v1572_v27 = vpop.eup %1571  ;;  %v253_v28 = vpop.xlane.xlu1 %252  ;;  %v294_v29 = vadd.f32 %v1327_v22, %v286_v23  ;;  %v73_v30 = vmul.f32 %v1570_v24, %v1845_v41 }
 0x14b   :  { %1581 = vrsqrt.f32 %v267_v25  ;;  %v261_v33 = vmul.f32 0.03125, %v253_v28  ;;  %v279_v31 = vmul.f32 %v1572_v27, %v1838_v32 }
 0x14c   :  { %1583 = vrsqrt.f32 %v268_v26  ;;  %1450 = vmatprep.mubr.f32.mxu1 %v294_v29  ;;  %v81_v34 = vmul.f32 %v1326_v15, %v73_v30 }
 0x14d   :  { %v1574_v35 = vpop.eup %1573  ;;  %v269_v36 = vadd.f32 1e-05, %v261_v33  ;;  %v287_v37 = vmul.f32 %v1326_v15, %v279_v31 }
 0x14e   :  { %v1576_v38 = vpop.eup %1575  ;;  %v89_v39 = vadd.f32 %v1327_v22, %v81_v34  ;;  %v74_v40 = vmul.f32 %v1574_v35, %v1848_v42 }
 0x14f   :  { %1585 = vrsqrt.f32 %v269_v36  ;;  %v295_v43 = vadd.f32 %v1327_v22, %v287_v37  ;;  %v280_v44 = vmul.f32 %v1576_v38, %v1857_v51 }
 0x150   :  { %1415 = vmatprep.mubr.f32.mxu0 %v89_v39  ;;  %v82_v41 = vmul.f32 %v1326_v15, %v74_v40 }
 0x151   :  { %v1578_v45 = vpop.eup %1577  ;;  %1451 = vmatmul.mubr.f32.vlgmr.msra.gmra.mrb[0].mxu1 %v295_v43  ;;  %v288_v46 = vmul.f32 %v1326_v15, %v280_v44 }
 0x152   :  { %v1580_v32 = vpop.eup %1579  ;;  %v90_v47 = vadd.f32 %v1327_v22, %v82_v41  ;;  %v281_v48 = vmul.f32 %v1578_v45, %v1860_v52 }
 0x153   :  { %v296_v49 = vadd.f32 %v1327_v22, %v288_v46  ;;  %v282_v50 = vmul.f32 %v1580_v32, %v1869_v61 }
 0x154   :  { %1416 = vmatmul.mubr.f32.vlgmr.msra.gmra.mrb[0].mxu0 %v90_v47  ;;  %v289_v53 = vmul.f32 %v1326_v15, %v281_v48 }
 0x155   :  { %v1582_v54 = vpop.eup %1581  ;;  %1453 = vmatprep.mubr.f32.mxu1 %v296_v49  ;;  %v290_v42 = vmul.f32 %v1326_v15, %v282_v50 }
 0x156   :  { %v1584_v55 = vpop.eup %1583  ;;  %v297_v56 = vadd.f32 %v1327_v22, %v289_v53  ;;  %v283_v51 = vmul.f32 %v1582_v54, %v1872_v62  ;;  %v460_v62 = vunpack.c.0.s8 %v459_v4 }
 0x157   :  { %v298_v57 = vadd.f32 %v1327_v22, %v290_v42  ;;  %v284_v58 = vmul.f32 %v1584_v55, %v1890_v6 }
 0x158   :  { %1454 = vmatmul.mubr.f32.gmra.mrb[2].mxu1 %v297_v56  ;;  %v291_v59 = vmul.f32 %v1326_v15, %v283_v51  ;;  %v1985_v6 = vsub.s32 %v460_v62, %v462_v5 }
 0x159   :  { %v1586_v60 = vpop.eup %1585  ;;  %1456 = vmatprep.mubr.f32.mxu1 %v298_v57  ;;  %v292_v52 = vmul.f32 %v1326_v15, %v284_v58 }
 0x15a   :  { %v299_v63 = vadd.f32 %v1327_v22, %v291_v59  ;;  %v285_v61 = vmul.f32 %v1586_v60, %v1893_v7 }
 0x15b   :  { %v300_v0 = vadd.f32 %v1327_v22, %v292_v52 }
 0x15c   :  { %1457 = vmatmul.mubr.f32.gmra.mrb[4].mxu1 %v299_v63  ;;  %v293_v1 = vmul.f32 %v1326_v15, %v285_v61  ;;  %v1993_v15 = vsub.s32 0, %v462_v5 }
 0x15d   :  { %1459 = vmatprep.mubr.f32.mxu1 %v300_v0 }
 0x15e   :  { %v301_v2 = vadd.f32 %v1327_v22, %v293_v1 }
 0x160   :  { %1460 = vmatmul.mubr.f32.gmra.mrb[6].mxu1 %v301_v2 }
 0x224   :  { %v1987_v8 = vpop.f32.mrb[0].mxu1 }
 0x225   :  { %v1989_v9 = vpop.f32.mrb[1].mxu1  ;;  %v2039_v42 = vcombine.high %v1987_v8, %v1987_v8 }
 0x226   :  { %v2006_v26 = vcombine.high %v1989_v9, %v1989_v9 }
 0x227   :  { %v1417_v10 = vpop.f32.mrb[0].mxu0 }
 0x228   :  { %v506_v11 = vcombine.high %v1417_v10, %v1417_v10  ;;  %v513_v7 = vrot.slane %v1417_v10, %v1985_v6  ;;  %v173_v12 = vpop.f32.mrb[1].mxu0 }
 0x229   :  { %v457_v13 = vcombine.high %v173_v12, %v173_v12  ;;  %v464_v14 = vrot.slane %v173_v12, %v1985_v6 }
 0x22a   :  { %v520_v16 = vrot.slane %v506_v11, %v1985_v6  ;;  %v521_v17 = vcombine.high %v513_v7, %v513_v7  ;;  %v529_v19 = vrot.slane %v513_v7, %v1985_v6 }
 0x22b   :  { %v471_v18 = vrot.slane %v457_v13, %v1985_v6  ;;  %v472_v20 = vcombine.high %v464_v14, %v464_v14  ;;  %v480_v21 = vrot.slane %v464_v14, %v1985_v6  ;;  %v1999_v22 = vpop.f32.mrb[2].mxu1 }
 0x22c   :  { %v543_v23 = vrot.slane %v521_v17, %v1985_v6  ;;  %v551_v24 = vcombine.high %v529_v19, %v529_v19  ;;  %v2002_v25 = vpop.f32.mrb[3].mxu1  ;;  %v522_v30 = vcombine.high %v520_v16, %v520_v16  ;;  %v536_v31 = vrot.slane %v520_v16, %v1985_v6 }
 0x22d   :  { %v487_v27 = vrot.slane %v471_v18, %v1985_v6  ;;  %v494_v28 = vrot.slane %v472_v20, %v1985_v6  ;;  %v502_v29 = vcombine.high %v480_v21, %v480_v21  ;;  %v558_v33 = vrot.slane %v480_v21, %v1993_v15 }
 0x22e   :  { %v598_v34 = vrot.slane %v551_v24, %v1993_v15  ;;  %v590_v37 = vrot.slane %v529_v19, %v1993_v15  ;;  %v473_v40 = vcombine.high %v471_v18, %v471_v18  ;;  %v606_v41 = vrot.slane %v536_v31, %v1993_v15 }
 0x22f   :  { %v2013_v35 = vpop.f32.mrb[4].mxu1  ;;  %v562_v36 = vrot.slane %v494_v28, %v1993_v15  ;;  %v566_v38 = vrot.slane %v502_v29, %v1993_v15  ;;  %v574_v39 = vrot.slane %v487_v27, %v1993_v15  ;;  %v635_v44 = vmul.f32 %v558_v33, %v1989_v9 }
 0x230   :  { %v2019_v43 = vpop.f32.mrb[5].mxu1  ;;  %v645_v45 = vmul.f32 %v2013_v35, %v598_v34  ;;  %v2026_v46 = vcombine.high %v2013_v35, %v2013_v35  ;;  %v553_v54 = vcombine.high %v543_v23, %v543_v23  ;;  %v504_v51 = vcombine.high %v494_v28, %v494_v28 }
 0x231   :  { %v636_v32 = vmul.f32 %v562_v36, %v2006_v26  ;;  %v643_v47 = vmul.f32 %v590_v37, %v2019_v43  ;;  %v637_v48 = vmul.f32 %v1987_v8, %v566_v38  ;;  %v2033_v49 = vcombine.high %v2019_v43, %v2019_v43 }
 0x232   :  { %v652_v50 = vsel %vm651_vm1, %v635_v44, 0.0  ;;  %v639_v53 = vmul.f32 %v574_v39, %v2002_v25  ;;  %v2046_v57 = vcombine.high %v2002_v25, %v2002_v25  ;;  %v682_v59 = vsel %vm651_vm1, %v645_v45, 0.0  ;;  %v451_v45 = vld [vmem:[#allocation2 + $0x20] sm:$0xff] }
 0x233   :  { %653 = vadd.xlane.f32.xlu0 %v652_v50  ;;  %v2041_v55 = vpop.f32.mrb[6].mxu1  ;;  %v655_v56 = vsel %vm651_vm1, %v636_v32, 0.0  ;;  %v602_v60 = vrot.slane %v553_v54, %v1993_v15  ;;  %v594_v52 = vrot.slane %v543_v23, %v1993_v15  ;;  %v570_v0 = vrot.slane %v504_v51, %v1993_v15  ;;  %v454_v50 = vld [vmem:[#allocation2 + $0x38] sm:$0xff] }
 0x234   :  { %v2048_v58 = vpop.f32.mrb[7].mxu1  ;;  %656 = vadd.xlane.f32.xlu1 %v655_v56  ;;  %v501_v1 = vrot.slane %v473_v40, %v1985_v6  ;;  %v503_v4 = vcombine.high %v487_v27, %v487_v27  ;;  %v550_v62 = vrot.slane %v522_v30, %v1985_v6  ;;  %v676_v5 = vsel %vm651_vm1, %v643_v47, 0.0 }
 0x235   :  { %v2055_v63 = vcombine.high %v2048_v58, %v2048_v58  ;;  %v647_v61 = vmul.f32 %v606_v41, %v2048_v58  ;;  %v646_v2 = vmul.f32 %v602_v60, %v2026_v46  ;;  %v644_v3 = vmul.f32 %v594_v52, %v2033_v49 }
 0x236   :  { %v638_v10 = vmul.f32 %v570_v0, %v2039_v42  ;;  %v578_v11 = vrot.slane %v501_v1, %v1993_v15  ;;  %v505_v7 = vcombine.high %v501_v1, %v501_v1  ;;  %v434_v12 = vcombine.high %v1999_v22, %v1999_v22 }
 0x237   :  { %683 = vadd.xlane.f32.xlu0 %v682_v59  ;;  %v582_v13 = vrot.slane %v503_v4, %v1993_v15  ;;  %v610_v14 = vrot.slane %v550_v62, %v1993_v15  ;;  %v658_v16 = vsel %vm651_vm1, %v637_v48, 0.0  ;;  %v552_v19 = vcombine.high %v536_v31, %v536_v31 }
 0x238   :  { %677 = vadd.xlane.f32.xlu1 %v676_v5  ;;  %v640_v6 = vmul.f32 %v578_v11, %v2046_v57  ;;  %v586_v17 = vrot.slane %v505_v7, %v1993_v15  ;;  %v438_v18 = vcombine.high %v2041_v55, %v2041_v55  ;;  %v554_v23 = vcombine.high %v550_v62, %v550_v62 }
 0x239   :  { %v641_v20 = vmul.f32 %v1999_v22, %v582_v13  ;;  %v648_v21 = vmul.f32 %v610_v14, %v2055_v63  ;;  %v664_v24 = vsel %vm651_vm1, %v639_v53, 0.0  ;;  %v614_v28 = vrot.slane %v552_v19, %v1993_v15 }
 0x23a   :  { %v642_v27 = vmul.f32 %v586_v17, %v434_v12  ;;  %v618_v29 = vrot.slane %v554_v23, %v1993_v15  ;;  %v685_v33 = vsel %vm651_vm1, %v646_v2, 0.0  ;;  %v661_v34 = vsel %vm651_vm1, %v638_v10, 0.0 }
 0x23b   :  { %659 = vadd.xlane.f32.xlu0 %v658_v16  ;;  %v649_v30 = vmul.f32 %v2041_v55, %v614_v28  ;;  %v679_v36 = vsel %vm651_vm1, %v644_v3, 0.0  ;;  %v667_v37 = vsel %vm651_vm1, %v640_v6, 0.0  ;;  %v688_v38 = vsel %vm651_vm1, %v647_v61, 0.0 }
 0x23c   :  { %665 = vadd.xlane.f32.xlu1 %v664_v24  ;;  %v650_v31 = vmul.f32 %v618_v29, %v438_v18  ;;  %v670_v15 = vsel %vm651_vm1, %v641_v20, 0.0  ;;  %v691_v39 = vsel %vm651_vm1, %v648_v21, 0.0  ;;  %v673_v40 = vsel %vm651_vm1, %v642_v27, 0.0 }
 0x23d   :  { %v694_v44 = vsel %vm651_vm1, %v649_v30, 0.0 }
 0x23e   :  { %v697_v41 = vsel %vm651_vm1, %v650_v31, 0.0 }
 0x23f   :  { %686 = vadd.xlane.f32.xlu0 %v685_v33 }
 0x240   :  { %662 = vadd.xlane.f32.xlu1 %v661_v34 }
 0x243   :  { %680 = vadd.xlane.f32.xlu0 %v679_v36 }
 0x244   :  { %668 = vadd.xlane.f32.xlu1 %v667_v37 }
 0x247   :  { %689 = vadd.xlane.f32.xlu0 %v688_v38 }
 0x248   :  { %671 = vadd.xlane.f32.xlu1 %v670_v15 }
 0x24b   :  { %692 = vadd.xlane.f32.xlu0 %v691_v39 }
 0x24c   :  { %674 = vadd.xlane.f32.xlu1 %v673_v40 }
 0x24f   :  { %695 = vadd.xlane.f32.xlu0 %v694_v44 }
 0x250   :  { %698 = vadd.xlane.f32.xlu1 %v697_v41 }
 0x261   :  { %1007 = vrot.lane.b32.xlu1 %v2006_v26, %s1705_s2 }
 0x265   :  { %1005 = vrot.lane.b32.xlu0 %v1989_v9, %s1705_s2  ;;  %1009 = vrot.lane.b32.xlu1 %v1987_v8, %s1705_s2  ;;  %v447_v8 = vld [vmem:[#allocation2] sm:$0xff]  ;;  %v448_v9 = vld [vmem:[#allocation2 + $0x8] sm:$0xff] }
 0x266   :  { %v1545_v26 = vpack.c.bf16 %v448_v9, %v447_v8 }
 0x268   :  { %1546 = vmatprep.subr.bf16.mxu0 %v1545_v26 }
 0x269   :  { %1023 = vrot.lane.b32.xlu0 %v2033_v49, %s1705_s2  ;;  %1021 = vrot.lane.b32.xlu1 %v2019_v43, %s1705_s2  ;;  %v450_v43 = vld [vmem:[#allocation2 + $0x18] sm:$0xff]  ;;  %v453_v49 = vld [vmem:[#allocation2 + $0x30] sm:$0xff] }
 0x26a   :  { %1548 = vmatpush3.bf16.msra.mxu0 %v1545_v26 }
 0x26d   :  { %1025 = vrot.lane.b32.xlu0 %v2013_v35, %s1705_s2  ;;  %1011 = vrot.lane.b32.xlu1 %v2039_v42, %s1705_s2  ;;  %v449_v35 = vld [vmem:[#allocation2 + $0x10] sm:$0xff]  ;;  %v1557_v42 = vpack.c.bf16 %v454_v50, %v453_v49 }
 0x271   :  { %1027 = vrot.lane.b32.xlu0 %v2026_v46, %s1705_s2  ;;  %1013 = vrot.lane.b32.xlu1 %v2002_v25, %s1705_s2  ;;  %v1549_v25 = vpack.c.bf16 %v450_v43, %v449_v35  ;;  %v452_v46 = vld [vmem:[#allocation2 + $0x28] sm:$0xff] }
 0x272   :  { %v1553_v32 = vpack.c.bf16 %v452_v46, %v451_v45 }
 0x273   :  { %1550 = vmatprep.subr.bf16.mxu0 %v1549_v25 }
 0x274   :  { %1552 = vmatpush3.bf16.msra.mxu0 %v1549_v25 }
 0x275   :  { %1029 = vrot.lane.b32.xlu0 %v2048_v58, %s1705_s2  ;;  %1015 = vrot.lane.b32.xlu1 %v2046_v57, %s1705_s2 }
 0x276   :  { %1554 = vmatprep.subr.bf16.mxu0 %v1553_v32 }
 0x278   :  { %1556 = vmatpush3.bf16.msra.mxu0 %v1553_v32 }
 0x279   :  { %1031 = vrot.lane.b32.xlu0 %v2055_v63, %s1705_s2  ;;  %1017 = vrot.lane.b32.xlu1 %v1999_v22, %s1705_s2 }
 0x27a   :  { %1558 = vmatprep.subr.bf16.mxu0 %v1557_v42 }
 0x27c   :  { %1560 = vmatpush3.bf16.msra.mxu0 %v1557_v42 }
 0x27d   :  { %1033 = vrot.lane.b32.xlu0 %v2041_v55, %s1705_s2  ;;  %1019 = vrot.lane.b32.xlu1 %v434_v12, %s1705_s2 }
 0x281   :  { %1035 = vrot.lane.b32.xlu1 %v438_v18, %s1705_s2 }
 0x2c0   :  { %v654_v47 = vpop.xlane.xlu0 %653 }
 0x2c1   :  { %v701_v22 = vsel %vm700_vm2, %v654_v47, -inf  ;;  %v657_v48 = vpop.xlane.xlu1 %656 }
 0x2c2   :  { %v702_v53 = vrot.slane %v701_v22, 4  ;;  %v708_v54 = vsel %vm700_vm2, %v657_v48, -inf }
 0x2c3   :  { %v709_v55 = vrot.slane %v708_v54, 4 }
 0x2c4   :  { %v703_v56 = vmax.f32 %v701_v22, %v702_v53  ;;  %v684_v51 = vpop.xlane.xlu0 %683 }
 0x2c5   :  { %v710_v57 = vmax.f32 %v708_v54, %v709_v55  ;;  %v771_v58 = vsel %vm700_vm2, %v684_v51, -inf  ;;  %v678_v59 = vpop.xlane.xlu1 %677 }
 0x2c6   :  { %v704_v60 = vrot.slane %v703_v56, 2  ;;  %v772_v52 = vrot.slane %v771_v58, 4  ;;  %v757_v63 = vsel %vm700_vm2, %v678_v59, -inf }
 0x2c7   :  { %v711_v61 = vrot.slane %v710_v57, 2  ;;  %v758_v0 = vrot.slane %v757_v63, 4 }
 0x2c8   :  { %v705_v1 = vmax.f32 %v703_v56, %v704_v60  ;;  %v773_v2 = vmax.f32 %v771_v58, %v772_v52  ;;  %v2109_v3 = vpop.xlane.xlu0 %659 }
 0x2c9   :  { %v712_v4 = vmax.f32 %v710_v57, %v711_v61  ;;  %v759_v62 = vmax.f32 %v757_v63, %v758_v0  ;;  %v715_v5 = vsel %vm700_vm2, %v2109_v3, -inf  ;;  %v2113_v10 = vpop.xlane.xlu1 %665 }
 0x2ca   :  { %v706_v11 = vrot.slane %v705_v1, 1  ;;  %v774_v7 = vrot.slane %v773_v2, 2  ;;  %v716_v12 = vrot.slane %v715_v5, 4  ;;  %v729_v13 = vsel %vm700_vm2, %v2113_v10, -inf }
 0x2cb   :  { %v713_v14 = vrot.slane %v712_v4, 1  ;;  %v760_v16 = vrot.slane %v759_v62, 2  ;;  %v730_v6 = vrot.slane %v729_v13, 4 }
 0x2cc   :  { %v707_v17 = vmax.f32 %v705_v1, %v706_v11  ;;  %v775_v19 = vmax.f32 %v773_v2, %v774_v7  ;;  %v717_v18 = vmax.f32 %v715_v5, %v716_v12  ;;  %v2117_v20 = vpop.xlane.xlu0 %686 }
 0x2cd   :  { %v714_v21 = vmax.f32 %v712_v4, %v713_v14  ;;  %v761_v23 = vmax.f32 %v759_v62, %v760_v16  ;;  %v731_v24 = vmax.f32 %v729_v13, %v730_v6  ;;  %v778_v27 = vsel %vm700_vm2, %v2117_v20, -inf  ;;  %v2121_v28 = vpop.xlane.xlu1 %662 }
 0x2ce   :  { %v813_v29 = vsub.f32 %v654_v47, %v707_v17  ;;  %v776_v30 = vrot.slane %v775_v19, 1  ;;  %v718_v33 = vrot.slane %v717_v18, 2  ;;  %v779_v31 = vrot.slane %v778_v27, 4 }
 0x2cf   :  { %v814_v34 = vsub.f32 %v657_v48, %v714_v21  ;;  %v762_v36 = vrot.slane %v761_v23, 1  ;;  %v732_v37 = vrot.slane %v731_v24, 2  ;;  %v722_v38 = vsel %vm700_vm2, %v2121_v28, -inf }
 0x2d0   :  { %v829_v15 = vmul.f32 1.442695, %v813_v29  ;;  %v777_v39 = vmax.f32 %v775_v19, %v776_v30  ;;  %v719_v40 = vmax.f32 %v717_v18, %v718_v33  ;;  %v780_v44 = vmax.f32 %v778_v27, %v779_v31  ;;  %v2125_v41 = vpop.xlane.xlu0 %680 }
 0x2d1   :  { %v831_v8 = vmul.f32 1.442695, %v814_v34  ;;  %v763_v9 = vmax.f32 %v761_v23, %v762_v36  ;;  %v733_v26 = vmax.f32 %v731_v24, %v732_v37  ;;  %v723_v35 = vrot.slane %v722_v38, 4  ;;  %v2127_v43 = vpop.xlane.xlu1 %668 }
 0x2d2   :  { %1587 = vpow2.f32 %v829_v15  ;;  %v823_v25 = vsub.f32 %v684_v51, %v777_v39  ;;  %v720_v45 = vrot.slane %v719_v40, 1  ;;  %v781_v46 = vrot.slane %v780_v44, 2 }
 0x2d3   :  { %1589 = vpow2.f32 %v831_v8  ;;  %v821_v32 = vsub.f32 %v678_v59, %v763_v9  ;;  %v734_v47 = vrot.slane %v733_v26, 1  ;;  %v724_v22 = vmax.f32 %v722_v38, %v723_v35 }
 0x2d4   :  { %v849_v48 = vmul.f32 1.442695, %v823_v25  ;;  %v721_v49 = vmax.f32 %v719_v40, %v720_v45  ;;  %v782_v50 = vmax.f32 %v780_v44, %v781_v46  ;;  %v764_v53 = vsel %vm700_vm2, %v2125_v41, -inf  ;;  %v2131_v54 = vpop.xlane.xlu0 %689 }
 0x2d5   :  { %v845_v42 = vmul.f32 1.442695, %v821_v32  ;;  %v735_v55 = vmax.f32 %v733_v26, %v734_v47  ;;  %v725_v56 = vrot.slane %v724_v22, 2  ;;  %v765_v57 = vrot.slane %v764_v53, 4  ;;  %v2137_v61 = vpop.xlane.xlu1 %671 }
 0x2d6   :  { %1591 = vpow2.f32 %v849_v48  ;;  %v815_v51 = vsub.f32 %v2109_v3, %v721_v49  ;;  %v783_v58 = vrot.slane %v782_v50, 1  ;;  %v736_v59 = vsel %vm700_vm2, %v2127_v43, -inf }
 0x2d7   :  { %1593 = vpow2.f32 %v845_v42  ;;  %v817_v60 = vsub.f32 %v2113_v10, %v735_v55  ;;  %v726_v52 = vmax.f32 %v724_v22, %v725_v56  ;;  %v766_v63 = vmax.f32 %v764_v53, %v765_v57 }
 0x2d8   :  { %v833_v0 = vmul.f32 1.442695, %v815_v51  ;;  %v784_v1 = vmax.f32 %v782_v50, %v783_v58  ;;  %v737_v2 = vrot.slane %v736_v59, 4  ;;  %v785_v4 = vsel %vm700_vm2, %v2131_v54, -inf  ;;  %v2144_v13 = vpop.xlane.xlu0 %692 }
 0x2d9   :  { %v837_v62 = vmul.f32 1.442695, %v817_v60  ;;  %v727_v5 = vrot.slane %v726_v52, 1  ;;  %v767_v3 = vrot.slane %v766_v63, 2  ;;  %v786_v11 = vrot.slane %v785_v4, 4  ;;  %v2166_v47 = vpop.xlane.xlu1 %674 }
 0x2da   :  { %1595 = vpow2.f32 %v833_v0  ;;  %v824_v7 = vsub.f32 %v2117_v20, %v784_v1  ;;  %v738_v12 = vmax.f32 %v736_v59, %v737_v2  ;;  %v743_v10 = vsel %vm700_vm2, %v2137_v61, -inf }
 0x2db   :  { %v728_v14 = vmax.f32 %v726_v52, %v727_v5  ;;  %v768_v16 = vmax.f32 %v766_v63, %v767_v3  ;;  %v787_v6 = vmax.f32 %v785_v4, %v786_v11  ;;  %v744_v18 = vrot.slane %v743_v10, 4 }
 0x2dc   :  { %v2146_v17 = vpop.eup %1587  ;;  %v739_v19 = vrot.slane %v738_v12, 2  ;;  %v792_v20 = vsel %vm700_vm2, %v2144_v13, -inf  ;;  %1597 = vpow2.f32 %v837_v62  ;;  %v851_v30 = vmul.f32 1.442695, %v824_v7  ;;  %v2177_v60 = vpop.xlane.xlu0 %695 }
 0x2dd   :  { %v2148_v21 = vpop.eup %1589  ;;  %v816_v23 = vsub.f32 %v2121_v28, %v728_v14  ;;  %v769_v24 = vrot.slane %v768_v16, 1  ;;  %v788_v27 = vrot.slane %v787_v6, 2  ;;  %v861_v29 = vsel %vm700_vm2, %v2146_v17, 0.0  ;;  %v2180_v5 = vpop.xlane.xlu1 %698 }
 0x2de   :  { %v740_v33 = vmax.f32 %v738_v12, %v739_v19  ;;  %v868_v31 = vsel %vm700_vm2, %v2148_v21, 0.0  ;;  %v745_v28 = vmax.f32 %v743_v10, %v744_v18  ;;  %v793_v15 = vrot.slane %v792_v20, 4 }
 0x2df   :  { %v835_v34 = vmul.f32 1.442695, %v816_v23  ;;  %v770_v36 = vmax.f32 %v768_v16, %v769_v24  ;;  %v789_v37 = vmax.f32 %v787_v6, %v788_v27  ;;  %v862_v8 = vrot.slane %v861_v29, 4 }
 0x2e0   :  { %v2157_v38 = vpop.eup %1591  ;;  %v741_v44 = vrot.slane %v740_v33, 1  ;;  %v869_v9 = vrot.slane %v868_v31, 4  ;;  %v746_v46 = vrot.slane %v745_v28, 2  ;;  %v794_v32 = vmax.f32 %v792_v20, %v793_v15 }
 0x2e1   :  { %v2159_v39 = vpop.eup %1593  ;;  %1599 = vpow2.f32 %v835_v34  ;;  %v822_v40 = vsub.f32 %v2125_v41, %v770_v36  ;;  %v790_v35 = vrot.slane %v789_v37, 1  ;;  %v931_v45 = vsel %vm700_vm2, %v2157_v38, 0.0 }
 0x2e2   :  { %1601 = vpow2.f32 %v851_v30  ;;  %v917_v22 = vsel %vm700_vm2, %v2159_v39, 0.0  ;;  %v742_v41 = vmax.f32 %v740_v33, %v741_v44  ;;  %v863_v49 = vadd.f32 %v862_v8, %v861_v29 }
 0x2e3   :  { %v847_v26 = vmul.f32 1.442695, %v822_v40  ;;  %v791_v48 = vmax.f32 %v789_v37, %v790_v35  ;;  %v870_v50 = vadd.f32 %v869_v9, %v868_v31  ;;  %v932_v42 = vrot.slane %v931_v45, 4 }
 0x2e4   :  { %v2162_v25 = vpop.eup %1595  ;;  %v747_v56 = vmax.f32 %v745_v28, %v746_v46  ;;  %v918_v51 = vrot.slane %v917_v22, 4  ;;  %v795_v58 = vrot.slane %v794_v32, 2  ;;  %v750_v59 = vsel %vm700_vm2, %v2166_v47, -inf }
 0x2e5   :  { %1603 = vpow2.f32 %v847_v26  ;;  %v875_v53 = vsel %vm700_vm2, %v2162_v25, 0.0  ;;  %v825_v55 = vsub.f32 %v2131_v54, %v791_v48  ;;  %v818_v63 = vsub.f32 %v2127_v43, %v742_v41 }
 0x2e6   :  { %v2173_v57 = vpop.eup %1597  ;;  %v876_v52 = vrot.slane %v875_v53, 4  ;;  %v864_v1 = vrot.slane %v863_v49, 2  ;;  %v871_v2 = vrot.slane %v870_v50, 2  ;;  %v796_v4 = vmax.f32 %v794_v32, %v795_v58 }
 0x2e7   :  { %v853_v0 = vmul.f32 1.442695, %v825_v55  ;;  %v751_v62 = vrot.slane %v750_v59, 4  ;;  %v2184_v3 = vadd.f32 %v932_v42, %v931_v45  ;;  %v748_v11 = vrot.slane %v747_v56, 1 }
 0x2e8   :  { %v799_v7 = vsel %vm700_vm2, %v2177_v60, -inf  ;;  %v2190_v10 = vadd.f32 %v918_v51, %v917_v22  ;;  %v2194_v43 = vsel %vm700_vm2, %v2173_v57, 0.0  ;;  %v797_v14 = vrot.slane %v796_v4, 1 }
 0x2e9   :  { %1605 = vpow2.f32 %v853_v0  ;;  %v752_v16 = vmax.f32 %v750_v59, %v751_v62  ;;  %v877_v6 = vadd.f32 %v876_v52, %v875_v53  ;;  %v839_v19 = vmul.f32 1.442695, %v818_v63 }
 0x2ea   :  { %v800_v18 = vrot.slane %v799_v7, 4  ;;  %v806_v23 = vsel %vm700_vm2, %v2180_v5, -inf  ;;  %v798_v27 = vmax.f32 %v796_v4, %v797_v14  ;;  %v749_v31 = vmax.f32 %v747_v56, %v748_v11 }
 0x2eb   :  { %v2182_v54 = vpop.eup %1599  ;;  %v753_v20 = vrot.slane %v752_v16, 2  ;;  %v807_v29 = vrot.slane %v806_v23, 4  ;;  %v865_v36 = vadd.f32 %v864_v1, %v863_v49  ;;  %v878_v44 = vrot.slane %v877_v6, 2 }
 0x2ec   :  { %v2188_v12 = vpop.eup %1601  ;;  %v882_v24 = vsel %vm700_vm2, %v2182_v54, 0.0  ;;  %v801_v34 = vmax.f32 %v799_v7, %v800_v18  ;;  %v826_v28 = vsub.f32 %v2144_v13, %v798_v27  ;;  %v872_v53 = vadd.f32 %v871_v2, %v870_v50 }
 0x2ed   :  { %v938_v33 = vsel %vm700_vm2, %v2188_v12, 0.0  ;;  %v754_v15 = vmax.f32 %v752_v16, %v753_v20  ;;  %v808_v40 = vmax.f32 %v806_v23, %v807_v29  ;;  %v883_v8 = vrot.slane %v882_v24, 4 }
 0x2ee   :  { %v802_v26 = vrot.slane %v801_v34, 2  ;;  %v855_v35 = vmul.f32 1.442695, %v826_v28  ;;  %v866_v32 = vrot.slane %v865_v36, 1  ;;  %v939_v22 = vrot.slane %v938_v33, 4 }
 0x2ef   :  { %v2200_v30 = vpop.eup %1603  ;;  %v755_v45 = vrot.slane %v754_v15, 1  ;;  %v809_v46 = vrot.slane %v808_v40, 2  ;;  %v819_v49 = vsub.f32 %v2137_v61, %v749_v31  ;;  %v884_v56 = vadd.f32 %v883_v8, %v882_v24 }
 0x2f0   :  { %v924_v37 = vsel %vm700_vm2, %v2200_v30, 0.0  ;;  %v803_v48 = vmax.f32 %v801_v34, %v802_v26  ;;  %1607 = vpow2.f32 %v855_v35  ;;  %v867_v59 = vadd.f32 %v866_v32, %v865_v36 }
 0x2f1   :  { %v925_v9 = vrot.slane %v924_v37, 4  ;;  %v756_v42 = vmax.f32 %v754_v15, %v755_v45  ;;  %v810_v55 = vmax.f32 %v808_v40, %v809_v46  ;;  %v934_v52 = vrot.slane %v2184_v3, 2 }
 0x2f2   :  { %v804_v58 = vrot.slane %v803_v48, 1  ;;  %v920_v63 = vrot.slane %v2190_v10, 2  ;;  %v890_v50 = vrot.slane %v2194_v43, 4  ;;  %v873_v4 = vrot.slane %v872_v53, 1 }
 0x2f3   :  { %v926_v41 = vadd.f32 %v925_v9, %v924_v37  ;;  %v2208_v13 = vpop.eup %1605  ;;  %v811_v1 = vrot.slane %v810_v55, 1  ;;  %1609 = vpow2.f32 %v839_v19  ;;  %v841_v62 = vmul.f32 1.442695, %v819_v49 }
 0x2f4   :  { %v945_v0 = vsel %vm700_vm2, %v2208_v13, 0.0  ;;  %v805_v2 = vmax.f32 %v803_v48, %v804_v58  ;;  %v820_v11 = vsub.f32 %v2166_v47, %v756_v42  ;;  %v940_v14 = vadd.f32 %v939_v22, %v938_v33 }
 0x2f5   :  { %v927_v51 = vrot.slane %v926_v41, 2  ;;  %v946_v61 = vrot.slane %v945_v0, 4  ;;  %v885_v16 = vrot.slane %v884_v56, 2  ;;  %1611 = vrcp.f32 %v867_v59  ;;  %v1006_v59 = vpop.permute.xlu0 %1005 }
 0x2f6   :  { %v879_v18 = vadd.f32 %v878_v44, %v877_v6  ;;  %v827_v23 = vsub.f32 %v2177_v60, %v805_v2  ;;  %v812_v24 = vmax.f32 %v810_v55, %v811_v1  ;;  %v935_v20 = vadd.f32 %v934_v52, %v2184_v3 }
 0x2f7   :  { %v928_v7 = vadd.f32 %v927_v51, %v926_v41  ;;  %v947_v29 = vadd.f32 %v946_v61, %v945_v0  ;;  %v874_v31 = vadd.f32 %v873_v4, %v872_v53  ;;  %v921_v34 = vadd.f32 %v920_v63, %v2190_v10  ;;  %v1008_v53 = vpop.permute.xlu1 %1007 }
 0x2f8   :  { %1613 = vpow2.f32 %v841_v62  ;;  %v843_v19 = vmul.f32 1.442695, %v820_v11  ;;  %v880_v36 = vrot.slane %v879_v18, 1  ;;  %v941_v37 = vrot.slane %v940_v14, 2 }
 0x2f9   :  { %v929_v27 = vrot.slane %v928_v7, 1  ;;  %v936_v28 = vrot.slane %v935_v20, 1  ;;  %v922_v33 = vrot.slane %v921_v34, 1  ;;  %v891_v6 = vadd.f32 %v890_v50, %v2194_v43 }
 0x2fa   :  { %v2219_v15 = vpop.eup %1607  ;;  %v857_v60 = vmul.f32 1.442695, %v827_v23  ;;  %v828_v40 = vsub.f32 %v2180_v5, %v812_v24  ;;  %v886_v44 = vadd.f32 %v885_v16, %v884_v56  ;;  %v948_v3 = vrot.slane %v947_v29, 2 }
 0x2fb   :  { %v930_v47 = vadd.f32 %v929_v27, %v928_v7  ;;  %1615 = vrcp.f32 %v874_v31  ;;  %v923_v8 = vadd.f32 %v922_v33, %v921_v34  ;;  %v952_v10 = vsel %vm700_vm2, %v2219_v15, 0.0  ;;  %v1010_v7 = vpop.permute.xlu1 %1009  ;;  %v1024_v27 = vpop.permute.xlu0 %1023 }
 0x2fc   :  { %1617 = vpow2.f32 %v843_v19  ;;  %v881_v9 = vadd.f32 %v880_v36, %v879_v18  ;;  %v937_v26 = vadd.f32 %v936_v28, %v935_v20  ;;  %v942_v35 = vadd.f32 %v941_v37, %v940_v14 }
 0x2fd   :  { %1619 = vrcp.f32 %v930_v47  ;;  %v2225_v45 = vpop.eup %1609  ;;  %v892_v46 = vrot.slane %v891_v6, 2  ;;  %v859_v43 = vmul.f32 1.442695, %v828_v40  ;;  %v887_v32 = vrot.slane %v886_v44, 1 }
 0x2fe   :  { %1621 = vpow2.f32 %v857_v60  ;;  %v953_v5 = vrot.slane %v952_v10, 4  ;;  %v949_v41 = vadd.f32 %v948_v3, %v947_v29  ;;  %v896_v48 = vsel %vm700_vm2, %v2225_v45, 0.0 }
 0x2ff   :  { %v1612_v22 = vpop.eup %1611  ;;  %1623 = vrcp.f32 %v923_v8  ;;  %v943_v49 = vrot.slane %v942_v35, 1  ;;  %v888_v56 = vadd.f32 %v887_v32, %v886_v44  ;;  %v893_v51 = vadd.f32 %v892_v46, %v891_v6  ;;  %v1022_v44 = vpop.permute.xlu1 %1021 }
 0x300   :  { %1625 = vrcp.f32 %v881_v9  ;;  %v989_v55 = vmul.f32 %v1612_v22, %v2146_v17  ;;  %v954_v58 = vadd.f32 %v953_v5, %v952_v10  ;;  %v950_v52 = vrot.slane %v949_v41, 1 }
 0x301   :  { %1627 = vrcp.f32 %v937_v26  ;;  %v897_v63 = vrot.slane %v896_v48, 4  ;;  %v944_v50 = vadd.f32 %v943_v49, %v942_v35  ;;  %v894_v4 = vrot.slane %v893_v51, 1  ;;  %v1026_v26 = vpop.permute.xlu0 %1025 }
 0x302   :  { %v2229_v42 = vpop.eup %1613  ;;  %1629 = vpow2.f32 %v859_v43  ;;  %v1053_v2 = vmul.f32 %v1006_v59, %v989_v55  ;;  %v955_v11 = vrot.slane %v954_v58, 2  ;;  %v951_v17 = vadd.f32 %v950_v52, %v949_v41 }
 0x303   :  { %v903_v1 = vsel %vm700_vm2, %v2229_v42, 0.0  ;;  %1631 = vrcp.f32 %v888_v56  ;;  %v898_v16 = vadd.f32 %v897_v63, %v896_v48  ;;  %v895_v34 = vadd.f32 %v894_v4, %v893_v51  ;;  %v1012_v51 = vpop.permute.xlu1 %1011 }
 0x304   :  { %v904_v18 = vrot.slane %v903_v1, 4  ;;  %1633 = vrcp.f32 %v944_v50  ;;  %v1069_v29 = vsel %vm651_vm1, %v1053_v2, 0.0  ;;  %v956_v37 = vadd.f32 %v955_v11, %v954_v58 }
 0x305   :  { %v1616_v0 = vpop.eup %1615  ;;  %1635 = vrcp.f32 %v951_v17  ;;  %v899_v28 = vrot.slane %v898_v16, 2  ;;  %v1070_v60 = vrot.slane %v1069_v29, 4 }
 0x306   :  { %v2234_v61 = vpop.eup %1617  ;;  %v990_v24 = vmul.f32 %v1616_v0, %v2148_v21  ;;  %v905_v33 = vadd.f32 %v904_v18, %v903_v1  ;;  %1637 = vrcp.f32 %v895_v34  ;;  %v957_v35 = vrot.slane %v956_v37, 1 }
 0x307   :  { %v1620_v62 = vpop.eup %1619  ;;  %v910_v6 = vsel %vm700_vm2, %v2234_v61, 0.0  ;;  %v900_v32 = vadd.f32 %v899_v28, %v898_v16  ;;  %v1071_v5 = vadd.f32 %v1070_v60, %v1069_v29 }
 0x308   :  { %v2236_v14 = vpop.eup %1621  ;;  %v998_v31 = vmul.f32 %v1620_v62, %v2200_v30  ;;  %v1054_v40 = vmul.f32 %v1008_v53, %v990_v24  ;;  %v906_v22 = vrot.slane %v905_v33, 2  ;;  %v958_v58 = vadd.f32 %v957_v35, %v956_v37  ;;  %v1028_v62 = vpop.permute.xlu0 %1027 }
 0x309   :  { %v1624_v23 = vpop.eup %1623  ;;  %v959_v36 = vsel %vm700_vm2, %v2236_v14, 0.0  ;;  %v901_v0 = vrot.slane %v900_v32, 1  ;;  %v1072_v50 = vrot.slane %v1071_v5, 2  ;;  %v1014_v37 = vpop.permute.xlu1 %1013 }
 0x30a   :  { %v1626_v20 = vpop.eup %1625  ;;  %v997_v21 = vmul.f32 %v1624_v23, %v2159_v39  ;;  %v960_v3 = vrot.slane %v959_v36, 4  ;;  %v1062_v8 = vmul.f32 %v1024_v27, %v998_v31  ;;  %v911_v39 = vrot.slane %v910_v6, 4 }
 0x30b   :  { %v1628_v19 = vpop.eup %1627  ;;  %v991_v30 = vmul.f32 %v1626_v20, %v2162_v25  ;;  %v1076_v41 = vsel %vm651_vm1, %v1054_v40, 0.0  ;;  %v907_v11 = vadd.f32 %v906_v22, %v905_v33  ;;  %1639 = vrcp.f32 %v958_v58 }
 0x30c   :  { %v2243_v47 = vpop.eup %1629  ;;  %v999_v10 = vmul.f32 %v1628_v19, %v2157_v38  ;;  %v1061_v43 = vmul.f32 %v1022_v44, %v997_v21  ;;  %v961_v48 = vadd.f32 %v960_v3, %v959_v36  ;;  %v1132_v49 = vsel %vm651_vm1, %v1062_v8, 0.0 }
 0x30d   :  { %v966_v9 = vsel %vm700_vm2, %v2243_v47, 0.0  ;;  %v1632_v46 = vpop.eup %1631  ;;  %v1055_v25 = vmul.f32 %v1010_v7, %v991_v30  ;;  %v912_v59 = vadd.f32 %v911_v39, %v910_v6  ;;  %v1077_v52 = vrot.slane %v1076_v41, 4  ;;  %v1030_v30 = vpop.permute.xlu0 %1029 }
 0x30e   :  { %v967_v53 = vrot.slane %v966_v9, 4  ;;  %v1063_v38 = vmul.f32 %v1026_v26, %v999_v10  ;;  %v1634_v55 = vpop.eup %1633  ;;  %v992_v56 = vmul.f32 %v1632_v46, %v2182_v54  ;;  %v1125_v63 = vsel %vm651_vm1, %v1061_v43, 0.0 }
 0x30f   :  { %v1636_v1 = vpop.eup %1635  ;;  %v1133_v2 = vrot.slane %v1132_v49, 4  ;;  %v1083_v4 = vsel %vm651_vm1, %v1055_v25, 0.0  ;;  %v962_v7 = vrot.slane %v961_v48, 2  ;;  %v1000_v54 = vmul.f32 %v1634_v55, %v2188_v12  ;;  %v1016_v25 = vpop.permute.xlu1 %1015 }
 0x310   :  { %v968_v17 = vadd.f32 %v967_v53, %v966_v9  ;;  %v1139_v16 = vsel %vm651_vm1, %v1063_v38, 0.0  ;;  %v1126_v18 = vrot.slane %v1125_v63, 4  ;;  %v1056_v23 = vmul.f32 %v1012_v51, %v992_v56  ;;  %v1638_v24 = vpop.eup %1637 }
 0x311   :  { %v913_v27 = vrot.slane %v912_v59, 2  ;;  %v1078_v20 = vadd.f32 %v1077_v52, %v1076_v41  ;;  %v1084_v29 = vrot.slane %v1083_v4, 4  ;;  %v1001_v31 = vmul.f32 %v1636_v1, %v2208_v13 }
 0x312   :  { %v2260_v34 = vadd.f32 %v1072_v50, %v1071_v5  ;;  %v1134_v19 = vadd.f32 %v1133_v2, %v1132_v49  ;;  %v1140_v36 = vrot.slane %v1139_v16, 4  ;;  %v902_v28 = vadd.f32 %v901_v0, %v900_v32 }
 0x313   :  { %v969_v33 = vrot.slane %v968_v17, 2  ;;  %v1064_v21 = vmul.f32 %v1028_v62, %v1000_v54  ;;  %v963_v6 = vadd.f32 %v962_v7, %v961_v48  ;;  %v908_v60 = vrot.slane %v907_v11, 1 }
 0x314   :  { %v1127_v12 = vadd.f32 %v1126_v18, %v1125_v63  ;;  %v1090_v40 = vsel %vm651_vm1, %v1056_v23, 0.0  ;;  %v993_v44 = vmul.f32 %v1638_v24, %v2173_v57  ;;  %1641 = vrcp.f32 %v902_v28  ;;  %v1018_v23 = vpop.permute.xlu1 %1017 }
 0x315   :  { %v1079_v3 = vrot.slane %v1078_v20, 2  ;;  %v1085_v8 = vadd.f32 %v1084_v29, %v1083_v4  ;;  %v1065_v13 = vmul.f32 %v1030_v30, %v1001_v31  ;;  %v964_v10 = vrot.slane %v963_v6, 1  ;;  %v1640_v38 = vpop.eup %1639  ;;  %v1032_v4 = vpop.permute.xlu0 %1031 }
 0x316   :  { %v1135_v9 = vrot.slane %v1134_v19, 2  ;;  %v1141_v26 = vadd.f32 %v1140_v36, %v1139_v16  ;;  %v909_v35 = vadd.f32 %v908_v60, %v907_v11  ;;  %v914_v46 = vadd.f32 %v913_v27, %v912_v59 }
 0x317   :  { %v1146_v39 = vsel %vm651_vm1, %v1064_v21, 0.0  ;;  %v1091_v43 = vrot.slane %v1090_v40, 4  ;;  %v965_v32 = vadd.f32 %v964_v10, %v963_v6  ;;  %v970_v22 = vadd.f32 %v969_v33, %v968_v17 }
 0x318   :  { %v1128_v5 = vrot.slane %v1127_v12, 2  ;;  %v1057_v41 = vmul.f32 %v1014_v37, %v993_v44  ;;  %1643 = vrcp.f32 %v909_v35  ;;  %v915_v48 = vrot.slane %v914_v46, 1 }
 0x319   :  { %v1086_v57 = vrot.slane %v1085_v8, 2  ;;  %v1153_v53 = vsel %vm651_vm1, %v1065_v13, 0.0  ;;  %1645 = vrcp.f32 %v965_v32  ;;  %v971_v49 = vrot.slane %v970_v22, 1 }
 0x31a   :  { %v1080_v55 = vadd.f32 %v1079_v3, %v1078_v20  ;;  %v1136_v56 = vadd.f32 %v1135_v9, %v1134_v19  ;;  %v1147_v51 = vrot.slane %v1146_v39, 4  ;;  %v916_v58 = vadd.f32 %v915_v48, %v914_v46 }
 0x31b   :  { %v1074_v59 = vrot.slane %v2260_v34, 1  ;;  %v1092_v52 = vadd.f32 %v1091_v43, %v1090_v40  ;;  %v1002_v63 = vmul.f32 %v1640_v38, %v2219_v15  ;;  %v972_v0 = vadd.f32 %v971_v49, %v970_v22  ;;  %v1034_v43 = vpop.permute.xlu0 %1033 }
 0x31c   :  { %v1129_v1 = vadd.f32 %v1128_v5, %v1127_v12  ;;  %v1154_v50 = vrot.slane %v1153_v53, 4  ;;  %v1097_v2 = vsel %vm651_vm1, %v1057_v41, 0.0  ;;  %1647 = vrcp.f32 %v916_v58 }
 0x31d   :  { %v1087_v62 = vadd.f32 %v1086_v57, %v1085_v8  ;;  %v1142_v11 = vrot.slane %v1141_v26, 2  ;;  %v1066_v7 = vmul.f32 %v1032_v4, %v1002_v63  ;;  %1649 = vrcp.f32 %v972_v0 }
 0x31e   :  { %v1642_v17 = vpop.eup %1641  ;;  %v1081_v16 = vrot.slane %v1080_v55, 1  ;;  %v1137_v54 = vrot.slane %v1136_v56, 1  ;;  %v1148_v18 = vadd.f32 %v1147_v51, %v1146_v39  ;;  %v1093_v24 = vrot.slane %v1092_v52, 2 }
 0x31f   :  { %v1098_v27 = vrot.slane %v1097_v2, 4  ;;  %v1160_v15 = vsel %vm651_vm1, %v1066_v7, 0.0  ;;  %v994_v20 = vmul.f32 %v1642_v17, %v2225_v45  ;;  %v1130_v29 = vrot.slane %v1129_v1, 1 }
 0x320   :  { %v1155_v31 = vadd.f32 %v1154_v50, %v1153_v53  ;;  %v1161_v19 = vrot.slane %v1160_v15, 4  ;;  %v2272_v36 = vadd.f32 %v1074_v59, %v2260_v34  ;;  %v1088_v37 = vrot.slane %v1087_v62, 1 }
 0x321   :  { %v1143_v28 = vadd.f32 %v1142_v11, %v1141_v26  ;;  %v1058_v33 = vmul.f32 %v1016_v25, %v994_v20  ;;  %v1082_v6 = vadd.f32 %v1081_v16, %v1080_v55  ;;  %v1138_v60 = vadd.f32 %v1137_v54, %v1136_v56  ;;  %v1020_v26 = vpop.permute.xlu1 %1019 }
 0x322   :  { %v1644_v21 = vpop.eup %1643  ;;  %v1149_v12 = vrot.slane %v1148_v18, 2  ;;  %v1162_v40 = vadd.f32 %v1161_v19, %v1160_v15  ;;  %v1094_v44 = vadd.f32 %v1093_v24, %v1092_v52  ;;  %v1099_v3 = vadd.f32 %v1098_v27, %v1097_v2 }
 0x323   :  { %v1646_v30 = vpop.eup %1645  ;;  %v1104_v45 = vsel %vm651_vm1, %v1058_v33, 0.0  ;;  %v995_v8 = vmul.f32 %v1644_v21, %v2229_v42  ;;  %v1131_v13 = vadd.f32 %v1130_v29, %v1129_v1  ;;  %v1156_v10 = vrot.slane %v1155_v31, 2 }
 0x324   :  { %v1105_v34 = vrot.slane %v1104_v45, 4  ;;  %v1003_v9 = vmul.f32 %v1646_v30, %v2236_v14  ;;  %v1089_v35 = vadd.f32 %v1088_v37, %v1087_v62  ;;  %v1144_v46 = vrot.slane %v1143_v28, 1 }
 0x325   :  { %v1163_v39 = vrot.slane %v1162_v40, 2  ;;  %v1059_v32 = vmul.f32 %v1018_v23, %v995_v8  ;;  %v1218_v5 = vsel %vm1204_vm3, %v1138_v60, %v1131_v13  ;;  %v1150_v41 = vadd.f32 %v1149_v12, %v1148_v18  ;;  %v1036_v4 = vpop.permute.xlu1 %1035 }
 0x326   :  { %v1648_v22 = vpop.eup %1647  ;;  %v1106_v25 = vadd.f32 %v1105_v34, %v1104_v45  ;;  %v1067_v48 = vmul.f32 %v1034_v43, %v1003_v9  ;;  %v1095_v42 = vrot.slane %v1094_v44, 1  ;;  %v1100_v53 = vrot.slane %v1099_v3, 2 }
 0x327   :  { %v1650_v57 = vpop.eup %1649  ;;  %v1111_v49 = vsel %vm651_vm1, %v1059_v32, 0.0  ;;  %v996_v14 = vmul.f32 %v1648_v22, %v2234_v61  ;;  %v1157_v38 = vadd.f32 %v1156_v10, %v1155_v31  ;;  %v1164_v58 = vadd.f32 %v1163_v39, %v1162_v40 }
 0x328   :  { %v1107_v55 = vrot.slane %v1106_v25, 2  ;;  %v1167_v56 = vsel %vm651_vm1, %v1067_v48, 0.0  ;;  %v1112_v51 = vrot.slane %v1111_v49, 4  ;;  %v1004_v63 = vmul.f32 %v1650_v57, %v2243_v47 }
 0x329   :  { %v1168_v59 = vrot.slane %v1167_v56, 4  ;;  %v1060_v52 = vmul.f32 %v1020_v26, %v996_v14  ;;  %v1145_v0 = vadd.f32 %v1144_v46, %v1143_v28  ;;  %v1151_v1 = vrot.slane %v1150_v41, 1 }
 0x32a   :  { %v1108_v50 = vadd.f32 %v1107_v55, %v1106_v25  ;;  %v1113_v2 = vadd.f32 %v1112_v51, %v1111_v49  ;;  %v1101_v62 = vadd.f32 %v1100_v53, %v1099_v3  ;;  %v1068_v7 = vmul.f32 %v1036_v4, %v1004_v63  ;;  %v1328_v53 = vld [vmem:[%s2323_s7] ss:$0 sm:$0xff]  ;;  %s1675_s7 = scalar_lea.vmem %s1315_s20, 256 }
 0x32b   :  { %v1169_v11 = vadd.f32 %v1168_v59, %v1167_v56  ;;  %v1118_v61 = vsel %vm651_vm1, %v1060_v52, 0.0  ;;  %v1219_v17 = vsel %vm1206_vm4, %v1145_v0, %v1218_v5  ;;  %v1096_v16 = vadd.f32 %v1095_v42, %v1094_v44  ;;  %v1651_v56 = vld [vmem:[%s2316_s0 + $0x8] sm:$0xff]  ;;  %p1676_p8 = scmp.ne.s32.totalorder %s1315_s20, %s1675_s7  ;;  %p1681_p10 = scmp.lt.s32.totalorder %s1675_s7, %s1675_s7 }
 0x32c   :  { %v1114_v54 = vrot.slane %v1113_v2, 2  ;;  %v1119_v18 = vrot.slane %v1118_v61, 4  ;;  %v1158_v23 = vrot.slane %v1157_v38, 1  ;;  %v1165_v24 = vrot.slane %v1164_v58, 1 }
 0x32d   :  { %v1170_v27 = vrot.slane %v1169_v11, 2  ;;  %v1174_v47 = vsel %vm651_vm1, %v1068_v7, 0.0  ;;  %v1109_v15 = vrot.slane %v1108_v50, 1  ;;  %v1205_v19 = vsel %vm1204_vm3, %v1082_v6, %v2272_v36  ;;  %p1682_p11 = por %p1681_p10, %p1680_p9 }
 0x32e   :  { %v1115_v20 = vadd.f32 %v1114_v54, %v1113_v2  ;;  %v1120_v29 = vadd.f32 %v1119_v18, %v1118_v61  ;;  %v1175_v31 = vrot.slane %v1174_v47, 4  ;;  %v1152_v37 = vadd.f32 %v1151_v1, %v1150_v41 }
 0x32f   :  { %v1102_v28 = vrot.slane %v1101_v62, 1  ;;  %v1171_v33 = vadd.f32 %v1170_v27, %v1169_v11  ;;  %v1207_v21 = vsel %vm1206_vm4, %v1089_v35, %v1205_v19  ;;  %v1159_v3 = vadd.f32 %v1158_v23, %v1157_v38  ;;  %p1683_p12 = pnand %p1682_p11, %p1676_p8 }
 0x330   :  { %v1116_v60 = vrot.slane %v1115_v20, 1  ;;  %v1121_v12 = vrot.slane %v1120_v29, 2  ;;  %v1176_v40 = vadd.f32 %v1175_v31, %v1174_v47  ;;  %v1220_v30 = vsel %vm1208_vm5, %v1152_v37, %v1219_v17 }
 0x331   :  { %v1209_v44 = vsel %vm1208_vm5, %v1096_v16, %v1207_v21  ;;  %v1172_v45 = vrot.slane %v1171_v33, 1  ;;  %v1166_v8 = vadd.f32 %v1165_v24, %v1164_v58  ;;  %v1110_v13 = vadd.f32 %v1109_v15, %v1108_v50  ;;  %v1652_v58 = vld [vmem:[%s2316_s0] sm:$0xff] }
 0x332   :  { %v1122_v10 = vadd.f32 %v1121_v12, %v1120_v29  ;;  %v1177_v34 = vrot.slane %v1176_v40, 2  ;;  %v1103_v9 = vadd.f32 %v1102_v28, %v1101_v62  ;;  %v1117_v6 = vadd.f32 %v1116_v60, %v1115_v20 }
 0x333   :  { %v1173_v36 = vadd.f32 %v1172_v45, %v1171_v33  ;;  %v1221_v35 = vsel %vm1210_vm6, %v1159_v3, %v1220_v30 }
 0x334   :  { %v1123_v26 = vrot.slane %v1122_v10, 1  ;;  %v1178_v46 = vadd.f32 %v1177_v34, %v1176_v40  ;;  %v1211_v39 = vsel %vm1210_vm6, %v1103_v9, %v1209_v44  ;;  %v1222_v5 = vsel %vm1212_vm7, %v1166_v8, %v1221_v35 }
 0x335   :  { %v1213_v22 = vsel %vm1212_vm7, %v1110_v13, %v1211_v39  ;;  %v1223_v25 = vsel %vm1214_vm8, %v1173_v36, %v1222_v5 }
 0x336   :  { %v1124_v43 = vadd.f32 %v1123_v26, %v1122_v10  ;;  %v1179_v32 = vrot.slane %v1178_v46, 1  ;;  %v1215_v41 = vsel %vm1214_vm8, %v1117_v6, %v1213_v22 }
 0x338   :  { %v1180_v48 = vadd.f32 %v1179_v32, %v1178_v46  ;;  %v1217_v57 = vsel %vm1216_vm9, %v1124_v43, %v1215_v41 }
 0x339   :  { %1478 = vmatprep.mubr.msk.f32.mxu0 %vm1225_vm10, %v1217_v57 }
 0x33a   :  { %v1224_v42 = vsel %vm1216_vm9, %v1180_v48, %v1223_v25 }
 0x33b   :  { %1479 = vmatmul.mubr.msk.f32.vlgmr.msra.gmra.mrb[2].mxu0 %vm1225_vm10, %v1224_v42 }
 0x40e   :  { %v1480_v49 = vpop.f32.mrb[2].mxu0 }
 0x40f   :  { %v1302_v14 = vadd.f32 %v1480_v49, %v1328_v53  ;;  %v1296_v38 = vpop.f32.mrb[3].mxu0 }
 0x410   :  { %v1297_v55 = vadd.f32 %v1328_v53, %v1296_v38 }
 0x411   :  { %v1306_v51 = vadd.f32 %v1651_v56, %v1302_v14 }
 0x412   :  { %v1305_v59 = vadd.f32 %v1652_v58, %v1297_v55 }
 0x413   :  { %1308 = vst [vmem:[#allocation5 + $0x8] sm:$0xff] %v1306_v51 }
 0x414   :  { %1307 = vst [vmem:[#allocation5] sm:$0xff] %v1305_v59 }
 0x415   :  { %1686 = shalt.err (!%p1683_p12)
}
 0x416   :  { %s1687_s26 = scalar_lea.hbm %s2324_s8, 256 }
 0x417   :  { %p1688_p13 = scmp.ne.s32.totalorder %s2324_s8, %s1687_s26  ;;  %p1691_p0 = scmp.lt.u32.totalorder %s1687_s26, %s2324_s8 }
 0x419   :  { %p1693_p1 = pnand %p1691_p0, %p1688_p13 }
 0x41b   :  { %1696 = shalt.err (!%p1693_p1)
}
 0x41c   :  { %1320 = dma.vmem_to_hbm [thread:$0]  %s1315_s20, 256, %s2324_s8, [#allocation4], %s1702_s15, %s1702_s15, %s1703_s16  }
 0x41d   :  { %1699 = dma.done.wait [#allocation4], 256  }
 0x41e   :  { %1700 = vsyncadd [#allocation4], 4294967040 }
 0x41f   :  { %1324 = vsyncpa [#allocation3], 1 }
 0x420   :  { %1325 = vsyncpa [#allocation4], 1 }

</bundles_post_ra>
